<compile_context>
chip_gen: v7x
topology: tpu7x:2x2x1
jax: 0.10.0
libtpu: 0.0.40
codegen_flags: <defaults>
</compile_context>

<pallas_src>
import jax
import jax.numpy as jnp
from jax import lax
from jax.experimental import pallas as pl
from jax.experimental.pallas import tpu as pltpu


def encoder_kernel(emb_ref, wih_ref, whh_ref, b_ref,
                   fcw_ref, fcb_ref, fc2w_ref, fc2b_ref,
                   out_ref, hid_ref, cell_ref,
                   gx_scr):
    """Fused bidirectional LSTM + tanh(fc) heads.

    emb_ref : [T*B, E]  bf16 embeddings, time-major flattened
    wih_ref : [E, 8H]   bf16 input->gates, gate-major cols [i_f i_b|f_f f_b|o_f o_b|g_f g_b]
    whh_ref : [2H, 8H]  f32 block-diagonal hidden->gates (fwd rows -> fwd cols only)
    b_ref   : [1, 8H]   f32 combined bias (b_ih + b_hh), same column layout
    fcw/fcb, fc2w/fc2b  : tanh(Linear) heads
    out_ref : [T, B, 2H] per-timestep hidden states, fwd in [:H], bwd in [H:]
    hid_ref : [B, dec]  tanh(fc(cat(h_fwd_final, h_bwd_final)))
    cell_ref: [B, dec]  tanh(fc2(cat(c_fwd_final, c_bwd_final)))
    gx_scr  : VMEM [T*B, 8H] bf16 — precomputed input projections (bias folded in)
    """
    T, B, H2 = out_ref.shape
    H = H2 // 2
    GW = 8 * H                       # total gate width (both directions)
    rows = T * B

    # ---------------- Phase 1: hoisted input projection (bulk MXU), chunked --------------
    # Chunk the [T*B, E] @ [E, 8H] matmul so compute streams straight to VMEM
    # stores instead of keeping the whole result live in vregs.
    chunk = rows
    for cand in (512, 256, 128):
        if rows % cand == 0:
            chunk = cand
            break
    n_chunks = rows // chunk
    b_bcast = jnp.broadcast_to(b_ref[...], (chunk, GW))      # hoisted broadcast

    if n_chunks == 1:
        g_all = jnp.dot(emb_ref[...], wih_ref[...],
                        preferred_element_type=jnp.float32) + b_bcast
        gx_scr[...] = g_all.astype(gx_scr.dtype)             # one lane-dense store
    else:
        def proj_body(ci, carry):
            r0 = ci * chunk
            if chunk % 8 == 0:
                r0 = pl.multiple_of(r0, 8)
            x = emb_ref[pl.ds(r0, chunk), :]
            g = jnp.dot(x, wih_ref[...],
                        preferred_element_type=jnp.float32) + b_bcast
            gx_scr[pl.ds(r0, chunk), :] = g.astype(gx_scr.dtype)
            return carry
        lax.fori_loop(0, n_chunks, proj_body, 0, unroll=False)

    # ---------------- Phase 2: bidirectional recurrence (latency-bound) ------------------
    # Backward-direction columns take their input projection from the
    # time-reversed row block; the select is hoistable/off the h->h chain.
    lane = lax.broadcasted_iota(jnp.int32, (B, GW), 1)
    bwd_mask = (lane % (2 * H)) >= H                          # hoisted, loop-invariant

    h0 = jnp.zeros((B, H2), jnp.float32)
    c0 = jnp.zeros((B, H2), jnp.float32)

    def step(t, carry):
        h, c = carry                                          # [B, 2H] f32 each
        rt = T - 1 - t
        tb = t * B
        rb = rt * B
        if B % 8 == 0:
            tb = pl.multiple_of(tb, 8)
            rb = pl.multiple_of(rb, 8)

        # Single block-diagonal recurrent matmul covers both directions.
        hh = jnp.dot(h, whh_ref[...], preferred_element_type=jnp.float32)   # [B, 8H]
        gxt = gx_scr[pl.ds(tb, B), :].astype(jnp.float32)     # fwd proj @ t
        gxr = gx_scr[pl.ds(rb, B), :].astype(jnp.float32)     # bwd proj @ T-1-t
        pre = hh + jnp.where(bwd_mask, gxr, gxt)              # [B, 8H]

        # Contiguous sigmoid region (i, f, o) and tanh region (g).
        sig = jax.nn.sigmoid(pre[:, :6 * H])
        g = jnp.tanh(pre[:, 6 * H:])
        i_g = sig[:, :H2]
        f_g = sig[:, H2:2 * H2]
        o_g = sig[:, 2 * H2:]

        c_new = f_g * c + i_g * g                             # full-width [B, 2H]
        h_new = o_g * jnp.tanh(c_new)

        out_ref[t] = h_new                                    # one full-width store/step
        return h_new, c_new

    h_fin, c_fin = lax.fori_loop(0, T, step, (h0, c0), unroll=min(T, 8))

    # ---------------- Phase 3: fix backward-half time order (bulk, off critical path) ----
    # out_ref[t] currently holds (fwd@t | bwd@(T-1-t)); swap bwd halves pairwise.
    lane2 = lax.broadcasted_iota(jnp.int32, (B, H2), 1)
    fwd_half = lane2 < H

    def swap_body(t, carry):
        rt = T - 1 - t
        a = out_ref[t]
        b = out_ref[rt]
        out_ref[t] = jnp.where(fwd_half, a, b)
        out_ref[rt] = jnp.where(fwd_half, b, a)
        return carry
    n_swaps = (T + 1) // 2
    lax.fori_loop(0, n_swaps, swap_body, 0, unroll=min(n_swaps, 8))

    # ---------------- Phase 4: fused tanh(fc) heads ---------------------------------------
    # State layout [B, 2H] already equals torch.cat((state[-2], state[-1]), dim=1).
    hid_ref[...] = jnp.tanh(
        jnp.dot(h_fin, fcw_ref[...], preferred_element_type=jnp.float32) + fcb_ref[...])
    cell_ref[...] = jnp.tanh(
        jnp.dot(c_fin, fc2w_ref[...], preferred_element_type=jnp.float32) + fc2b_ref[...])


# PyTorch gate order (i, f, g, o) -> kernel gate-block order (i, f, o, g).
_GATE_PERM = (0, 1, 3, 2)


def _pack_gate_major(w2, H):
    """[2, K, 4H] (per-direction, PyTorch gate order) -> [K, 8H] gate-major layout."""
    cols = []
    for gi in _GATE_PERM:
        cols.append(w2[0, :, gi * H:(gi + 1) * H])   # forward block
        cols.append(w2[1, :, gi * H:(gi + 1) * H])   # backward block
    return jnp.concatenate(cols, axis=1)


def _pack_whh_block_diag(whh2, H):
    """[2, H, 4H] -> block-diagonal [2H, 8H]: fwd h rows feed only fwd gate cols."""
    # TODO(synk): for H >= 128, benchmark two per-direction [B,H]@[H,4H] pushes
    # against this doubled-K block-diagonal push (half the MACs are zeros).
    out = jnp.zeros((2 * H, 8 * H), whh2.dtype)
    for bi, gi in enumerate(_GATE_PERM):
        out = out.at[:H, bi * 2 * H:bi * 2 * H + H].set(whh2[0, :, gi * H:(gi + 1) * H])
        out = out.at[H:, bi * 2 * H + H:(bi + 1) * 2 * H].set(whh2[1, :, gi * H:(gi + 1) * H])
    return out


def encoder_forward(src, params):
    # Embedding lookup (gather) in bf16 + dropout-as-identity: plain-JAX glue.
    # TODO(synk): for long sequences, gather in-kernel via scalar-prefetched src and
    # stream T-chunks of emb/gx through HBM with manual double-buffering (needed on
    # v7x's 64 MiB VMEM); also add a batch-parallel grid axis to use both v7x TCs.
    T, B = src.shape
    H = params["whh"].shape[1]
    dec = params["fc_w"].shape[1]

    emb = params["embedding"].astype(jnp.bfloat16)[src]                  # [T, B, E] bf16
    E = emb.shape[-1]
    emb2d = emb.reshape(T * B, E)

    # One-time weight re-packing into the kernel's gate-major layout.
    wih_all = _pack_gate_major(params["wih"], H).astype(jnp.bfloat16)    # [E, 8H]
    b_all = _pack_gate_major(params["b"], H).astype(jnp.float32)         # [1, 8H]
    whh_bd = _pack_whh_block_diag(params["whh"], H).astype(jnp.float32)  # [2H, 8H]

    # VMEM budget from the real footprint (with headroom), clamped so it also
    # fits v7x's 64 MiB physical VMEM.
    footprint = (emb2d.size * 2 + wih_all.size * 2 + whh_bd.size * 4 + b_all.size * 4
                 + params["fc_w"].size * 4 + params["fc_b"].size * 4
                 + params["fc2_w"].size * 4 + params["fc2_b"].size * 4
                 + T * B * 2 * H * 4 + 2 * B * dec * 4      # outputs
                 + T * B * 8 * H * 2)                       # gx scratch (bf16)
    vmem_limit = int(min(max(2 * footprint + (4 << 20), 16 << 20), 64 << 20))

    vmem = pl.BlockSpec(memory_space=pltpu.MemorySpace.VMEM)

    outputs, hidden, cell_state = pl.pallas_call(
        encoder_kernel,
        out_shape=(
            jax.ShapeDtypeStruct((T, B, 2 * H), jnp.float32),
            jax.ShapeDtypeStruct((B, dec), jnp.float32),
            jax.ShapeDtypeStruct((B, dec), jnp.float32),
        ),
        in_specs=[vmem] * 8,
        out_specs=(vmem, vmem, vmem),
        scratch_shapes=[pltpu.VMEM((T * B, 8 * H), jnp.bfloat16)],
        compiler_params=pltpu.CompilerParams(vmem_limit_bytes=vmem_limit),
    )(emb2d, wih_all, whh_bd, b_all,
      params["fc_w"], params["fc_b"], params["fc2_w"], params["fc2_b"])

    return outputs, hidden, cell_state


def init_params(key, input_dim, emb_dim, enc_hid, dec_hid):
    ks = jax.random.split(key, 8)
    sH = enc_hid ** -0.5
    sF = (2 * enc_hid) ** -0.5

    def u(k, shape, s):
        return jax.random.uniform(k, shape, jnp.float32, -s, s)

    return {
        "embedding": jax.random.normal(ks[0], (input_dim, emb_dim), jnp.float32),
        # LSTM weights pre-transposed (x @ W), per direction (0 = fwd, 1 = bwd), gate
        # blocks in PyTorch order (i, f, g, o); bias is b_ih + b_hh pre-summed.
        # (To load real PyTorch weights: transpose W_ih/W_hh and sum the biases; the
        #  wrapper handles the gate permutation / gate-major packing.)
        "wih": u(ks[1], (2, emb_dim, 4 * enc_hid), sH),
        "whh": u(ks[2], (2, enc_hid, 4 * enc_hid), sH),
        "b":   u(ks[3], (2, 1, 4 * enc_hid), sH),
        "fc_w": u(ks[4], (2 * enc_hid, dec_hid), sF),
        "fc_b": u(ks[5], (1, dec_hid), sF),
        "fc2_w": u(ks[6], (2 * enc_hid, dec_hid), sF),
        "fc2_b": u(ks[7], (1, dec_hid), sF),
    }


if __name__ == "__main__":
    INPUT_DIM, EMB_DIM, ENC_HID, DEC_HID = 50, 32, 32, 32
    T, B = 8, 2

    key = jax.random.PRNGKey(0)
    pkey, skey = jax.random.split(key)
    params = init_params(pkey, INPUT_DIM, EMB_DIM, ENC_HID, DEC_HID)
    src = jax.random.randint(skey, (T, B), 0, INPUT_DIM, dtype=jnp.int32)  # [T, B]

    outputs, hidden, cell_state = jax.jit(encoder_forward)(src, params)
    jax.block_until_ready((outputs, hidden, cell_state))

    assert outputs.shape == (T, B, 2 * ENC_HID)
    assert hidden.shape == (B, DEC_HID)
    assert cell_state.shape == (B, DEC_HID)
    assert bool(jnp.all(jnp.isfinite(outputs)))
    assert bool(jnp.all(jnp.isfinite(hidden)))
    assert bool(jnp.all(jnp.isfinite(cell_state)))
    print("KERNEL_OK")
</pallas_src>

<mosaic_0001>
module attributes {stable_mosaic.version = 11 : i64} {
  func.func @encoder_kernel(%arg0: memref<16x32xbf16, #tpu.memory_space<vmem>>, %arg1: memref<32x256xbf16, #tpu.memory_space<vmem>>, %arg2: memref<64x256xf32, #tpu.memory_space<vmem>>, %arg3: memref<1x256xf32, #tpu.memory_space<vmem>>, %arg4: memref<64x32xf32, #tpu.memory_space<vmem>>, %arg5: memref<1x32xf32, #tpu.memory_space<vmem>>, %arg6: memref<64x32xf32, #tpu.memory_space<vmem>>, %arg7: memref<1x32xf32, #tpu.memory_space<vmem>>, %arg8: memref<8x2x64xf32, #tpu.memory_space<vmem>>, %arg9: memref<2x32xf32, #tpu.memory_space<vmem>>, %arg10: memref<2x32xf32, #tpu.memory_space<vmem>>, %arg11: memref<16x256xbf16, #tpu.memory_space<vmem>>) attributes {dimension_semantics = [], scalar_prefetch = 0 : i64, scratch_operands = 1 : i64, tpu.core_type = #tpu.core_type<tc>} {
    %c0 = arith.constant 0 : index
    %c0_0 = arith.constant 0 : index
    %0 = vector.load %arg3[%c0, %c0_0] : memref<1x256xf32, #tpu.memory_space<vmem>>, vector<1x256xf32>
    %1 = vector.shape_cast %0 : vector<1x256xf32> to vector<1x256xf32>
    %2 = vector.broadcast %1 : vector<1x256xf32> to vector<16x256xf32>
    %c0_1 = arith.constant 0 : index
    %c0_2 = arith.constant 0 : index
    %3 = vector.load %arg0[%c0_1, %c0_2] : memref<16x32xbf16, #tpu.memory_space<vmem>>, vector<16x32xbf16>
    %c0_3 = arith.constant 0 : index
    %c0_4 = arith.constant 0 : index
    %4 = vector.load %arg1[%c0_3, %c0_4] : memref<32x256xbf16, #tpu.memory_space<vmem>>, vector<32x256xbf16>
    %cst = arith.constant dense<0.000000e+00> : vector<16x256xf32>
    %5 = tpu.matmul %3, %4, %cst {dimension_numbers = #tpu.dot_dimension_numbers<[1], [0], [0], [1], [0, 0, 1, 1], [], []>} : vector<16x32xbf16>, vector<32x256xbf16>, vector<16x256xf32> -> vector<16x256xf32>
    %6 = arith.addf %5, %2 : vector<16x256xf32>
    %7 = arith.truncf %6 : vector<16x256xf32> to vector<16x256xbf16>
    %c0_5 = arith.constant 0 : index
    %c0_6 = arith.constant 0 : index
    %8 = vector.load %arg11[%c0_5, %c0_6] : memref<16x256xbf16, #tpu.memory_space<vmem>>, vector<16x256xbf16>
    tpu.vector_store %arg11[%c0_5, %c0_6], %7 {strides = array<i32>} : memref<16x256xbf16, #tpu.memory_space<vmem>>, vector<16x256xbf16>,
    %9 = tpu.iota {dimensions = array<i32: 1>} : vector<2x256xi32>
    %c64_i32 = arith.constant 64 : i32
    %c0_i32 = arith.constant 0 : i32
    %10 = arith.cmpi eq, %c64_i32, %c0_i32 : i32
    %c1_i32 = arith.constant 1 : i32
    %11 = arith.select %10, %c1_i32, %c64_i32 : i32
    %12 = vector.broadcast %11 : i32 to vector<2x256xi32>
    %13 = arith.remsi %9, %12 : vector<2x256xi32>
    %c0_i32_7 = arith.constant 0 : i32
    %14 = vector.broadcast %c0_i32_7 : i32 to vector<2x256xi32>
    %15 = arith.cmpi ne, %13, %14 : vector<2x256xi32>
    %c0_i32_8 = arith.constant 0 : i32
    %16 = vector.broadcast %c0_i32_8 : i32 to vector<2x256xi32>
    %17 = arith.cmpi slt, %13, %16 : vector<2x256xi32>
    %c0_i32_9 = arith.constant 0 : i32
    %18 = arith.cmpi slt, %11, %c0_i32_9 : i32
    %19 = vector.broadcast %18 : i1 to vector<2x256xi1>
    %20 = vector.broadcast %19 : vector<2x256xi1> to vector<2x256xi1>
    %21 = arith.xori %17, %20 : vector<2x256xi1>
    %22 = arith.andi %21, %15 : vector<2x256xi1>
    %23 = vector.broadcast %11 : i32 to vector<2x256xi32>
    %24 = arith.addi %13, %23 : vector<2x256xi32>
    %25 = arith.select %22, %24, %13 : vector<2x256xi1>, vector<2x256xi32>
    %c32_i32 = arith.constant 32 : i32
    %26 = vector.broadcast %c32_i32 : i32 to vector<2x256xi32>
    %27 = arith.cmpi sge, %25, %26 : vector<2x256xi32>
    %cst_10 = arith.constant 0.000000e+00 : f32
    %28 = vector.broadcast %cst_10 : f32 to vector<2x64xf32>
    %cst_11 = arith.constant 0.000000e+00 : f32
    %29 = vector.broadcast %cst_11 : f32 to vector<2x64xf32>
    %c0_i32_12 = arith.constant 0 : i32
    %c7_i32 = arith.constant 7 : i32
    %30 = arith.subi %c7_i32, %c0_i32_12 : i32
    %c2_i32 = arith.constant 2 : i32
    %31 = arith.muli %c0_i32_12, %c2_i32 : i32
    %c2_i32_13 = arith.constant 2 : i32
    %32 = arith.muli %30, %c2_i32_13 : i32
    %c0_14 = arith.constant 0 : index
    %c0_15 = arith.constant 0 : index
    %33 = vector.load %arg2[%c0_14, %c0_15] : memref<64x256xf32, #tpu.memory_space<vmem>>, vector<64x256xf32>
    %cst_16 = arith.constant dense<0.000000e+00> : vector<2x256xf32>
    %34 = tpu.matmul %28, %33, %cst_16 {dimension_numbers = #tpu.dot_dimension_numbers<[1], [0], [0], [1], [0, 0, 1, 1], [], []>} : vector<2x64xf32>, vector<64x256xf32>, vector<2x256xf32> -> vector<2x256xf32>
    %35 = arith.index_cast %31 : i32 to index
    %c0_17 = arith.constant 0 : index
    %36 = vector.load %arg11[%35, %c0_17] : memref<16x256xbf16, #tpu.memory_space<vmem>>, vector<2x256xbf16>
    %37 = arith.extf %36 : vector<2x256xbf16> to vector<2x256xf32>
    %38 = arith.index_cast %32 : i32 to index
    %c0_18 = arith.constant 0 : index
    %39 = vector.load %arg11[%38, %c0_18] : memref<16x256xbf16, #tpu.memory_space<vmem>>, vector<2x256xbf16>
    %40 = arith.extf %39 : vector<2x256xbf16> to vector<2x256xf32>
    %41 = arith.select %27, %40, %37 : vector<2x256xi1>, vector<2x256xf32>
    %42 = arith.addf %34, %41 : vector<2x256xf32>
    %43 = vector.extract_strided_slice %42 {offsets = [0, 0], sizes = [2, 192], strides = [1, 1]} : vector<2x256xf32> to vector<2x192xf32>
    %44 = arith.negf %43 : vector<2x192xf32>
    %45 = math.exp %44 : vector<2x192xf32>
    %cst_19 = arith.constant 1.000000e+00 : f32
    %46 = vector.broadcast %cst_19 : f32 to vector<2x192xf32>
    %47 = arith.addf %46, %45 : vector<2x192xf32>
    %48 = arith.divf %46, %47 : vector<2x192xf32>
    %49 = vector.extract_strided_slice %42 {offsets = [0, 192], sizes = [2, 64], strides = [1, 1]} : vector<2x256xf32> to vector<2x64xf32>
    %50 = math.tanh %49 : vector<2x64xf32>
    %51 = vector.extract_strided_slice %48 {offsets = [0, 0], sizes = [2, 64], strides = [1, 1]} : vector<2x192xf32> to vector<2x64xf32>
    %52 = vector.extract_strided_slice %48 {offsets = [0, 64], sizes = [2, 64], strides = [1, 1]} : vector<2x192xf32> to vector<2x64xf32>
    %53 = vector.extract_strided_slice %48 {offsets = [0, 128], sizes = [2, 64], strides = [1, 1]} : vector<2x192xf32> to vector<2x64xf32>
    %54 = arith.mulf %52, %29 : vector<2x64xf32>
    %55 = arith.mulf %51, %50 : vector<2x64xf32>
    %56 = arith.addf %54, %55 : vector<2x64xf32>
    %57 = math.tanh %56 : vector<2x64xf32>
    %58 = arith.mulf %53, %57 : vector<2x64xf32>
    %59 = arith.index_cast %c0_i32_12 : i32 to index
    %c0_20 = arith.constant 0 : index
    %c0_21 = arith.constant 0 : index
    %60 = vector.load %arg8[%59, %c0_20, %c0_21] : memref<8x2x64xf32, #tpu.memory_space<vmem>>, vector<1x2x64xf32>
    %61 = vector.shape_cast %60 : vector<1x2x64xf32> to vector<2x64xf32>
    %62 = vector.shape_cast %58 : vector<2x64xf32> to vector<1x2x64xf32>
    tpu.vector_store %arg8[%59, %c0_20, %c0_21], %62 {strides = array<i32>} : memref<8x2x64xf32, #tpu.memory_space<vmem>>, vector<1x2x64xf32>,
    %c1_i32_22 = arith.constant 1 : i32
    %c7_i32_23 = arith.constant 7 : i32
    %63 = arith.subi %c7_i32_23, %c1_i32_22 : i32
    %c2_i32_24 = arith.constant 2 : i32
    %64 = arith.muli %c1_i32_22, %c2_i32_24 : i32
    %c2_i32_25 = arith.constant 2 : i32
    %65 = arith.muli %63, %c2_i32_25 : i32
    %c0_26 = arith.constant 0 : index
    %c0_27 = arith.constant 0 : index
    %66 = vector.load %arg2[%c0_26, %c0_27] : memref<64x256xf32, #tpu.memory_space<vmem>>, vector<64x256xf32>
    %cst_28 = arith.constant dense<0.000000e+00> : vector<2x256xf32>
    %67 = tpu.matmul %58, %66, %cst_28 {dimension_numbers = #tpu.dot_dimension_numbers<[1], [0], [0], [1], [0, 0, 1, 1], [], []>} : vector<2x64xf32>, vector<64x256xf32>, vector<2x256xf32> -> vector<2x256xf32>
    %68 = arith.index_cast %64 : i32 to index
    %c0_29 = arith.constant 0 : index
    %69 = vector.load %arg11[%68, %c0_29] : memref<16x256xbf16, #tpu.memory_space<vmem>>, vector<2x256xbf16>
    %70 = arith.extf %69 : vector<2x256xbf16> to vector<2x256xf32>
    %71 = arith.index_cast %65 : i32 to index
    %c0_30 = arith.constant 0 : index
    %72 = vector.load %arg11[%71, %c0_30] : memref<16x256xbf16, #tpu.memory_space<vmem>>, vector<2x256xbf16>
    %73 = arith.extf %72 : vector<2x256xbf16> to vector<2x256xf32>
    %74 = arith.select %27, %73, %70 : vector<2x256xi1>, vector<2x256xf32>
    %75 = arith.addf %67, %74 : vector<2x256xf32>
    %76 = vector.extract_strided_slice %75 {offsets = [0, 0], sizes = [2, 192], strides = [1, 1]} : vector<2x256xf32> to vector<2x192xf32>
    %77 = arith.negf %76 : vector<2x192xf32>
    %78 = math.exp %77 : vector<2x192xf32>
    %cst_31 = arith.constant 1.000000e+00 : f32
    %79 = vector.broadcast %cst_31 : f32 to vector<2x192xf32>
    %80 = arith.addf %79, %78 : vector<2x192xf32>
    %81 = arith.divf %79, %80 : vector<2x192xf32>
    %82 = vector.extract_strided_slice %75 {offsets = [0, 192], sizes = [2, 64], strides = [1, 1]} : vector<2x256xf32> to vector<2x64xf32>
    %83 = math.tanh %82 : vector<2x64xf32>
    %84 = vector.extract_strided_slice %81 {offsets = [0, 0], sizes = [2, 64], strides = [1, 1]} : vector<2x192xf32> to vector<2x64xf32>
    %85 = vector.extract_strided_slice %81 {offsets = [0, 64], sizes = [2, 64], strides = [1, 1]} : vector<2x192xf32> to vector<2x64xf32>
    %86 = vector.extract_strided_slice %81 {offsets = [0, 128], sizes = [2, 64], strides = [1, 1]} : vector<2x192xf32> to vector<2x64xf32>
    %87 = arith.mulf %85, %56 : vector<2x64xf32>
    %88 = arith.mulf %84, %83 : vector<2x64xf32>
    %89 = arith.addf %87, %88 : vector<2x64xf32>
    %90 = math.tanh %89 : vector<2x64xf32>
    %91 = arith.mulf %86, %90 : vector<2x64xf32>
    %92 = arith.index_cast %c1_i32_22 : i32 to index
    %c0_32 = arith.constant 0 : index
    %c0_33 = arith.constant 0 : index
    %93 = vector.load %arg8[%92, %c0_32, %c0_33] : memref<8x2x64xf32, #tpu.memory_space<vmem>>, vector<1x2x64xf32>
    %94 = vector.shape_cast %93 : vector<1x2x64xf32> to vector<2x64xf32>
    %95 = vector.shape_cast %91 : vector<2x64xf32> to vector<1x2x64xf32>
    tpu.vector_store %arg8[%92, %c0_32, %c0_33], %95 {strides = array<i32>} : memref<8x2x64xf32, #tpu.memory_space<vmem>>, vector<1x2x64xf32>,
    %c2_i32_34 = arith.constant 2 : i32
    %c7_i32_35 = arith.constant 7 : i32
    %96 = arith.subi %c7_i32_35, %c2_i32_34 : i32
    %c2_i32_36 = arith.constant 2 : i32
    %97 = arith.muli %c2_i32_34, %c2_i32_36 : i32
    %c2_i32_37 = arith.constant 2 : i32
    %98 = arith.muli %96, %c2_i32_37 : i32
    %c0_38 = arith.constant 0 : index
    %c0_39 = arith.constant 0 : index
    %99 = vector.load %arg2[%c0_38, %c0_39] : memref<64x256xf32, #tpu.memory_space<vmem>>, vector<64x256xf32>
    %cst_40 = arith.constant dense<0.000000e+00> : vector<2x256xf32>
    %100 = tpu.matmul %91, %99, %cst_40 {dimension_numbers = #tpu.dot_dimension_numbers<[1], [0], [0], [1], [0, 0, 1, 1], [], []>} : vector<2x64xf32>, vector<64x256xf32>, vector<2x256xf32> -> vector<2x256xf32>
    %101 = arith.index_cast %97 : i32 to index
    %c0_41 = arith.constant 0 : index
    %102 = vector.load %arg11[%101, %c0_41] : memref<16x256xbf16, #tpu.memory_space<vmem>>, vector<2x256xbf16>
    %103 = arith.extf %102 : vector<2x256xbf16> to vector<2x256xf32>
    %104 = arith.index_cast %98 : i32 to index
    %c0_42 = arith.constant 0 : index
    %105 = vector.load %arg11[%104, %c0_42] : memref<16x256xbf16, #tpu.memory_space<vmem>>, vector<2x256xbf16>
    %106 = arith.extf %105 : vector<2x256xbf16> to vector<2x256xf32>
    %107 = arith.select %27, %106, %103 : vector<2x256xi1>, vector<2x256xf32>
    %108 = arith.addf %100, %107 : vector<2x256xf32>
    %109 = vector.extract_strided_slice %108 {offsets = [0, 0], sizes = [2, 192], strides = [1, 1]} : vector<2x256xf32> to vector<2x192xf32>
    %110 = arith.negf %109 : vector<2x192xf32>
    %111 = math.exp %110 : vector<2x192xf32>
    %cst_43 = arith.constant 1.000000e+00 : f32
    %112 = vector.broadcast %cst_43 : f32 to vector<2x192xf32>
    %113 = arith.addf %112, %111 : vector<2x192xf32>
    %114 = arith.divf %112, %113 : vector<2x192xf32>
    %115 = vector.extract_strided_slice %108 {offsets = [0, 192], sizes = [2, 64], strides = [1, 1]} : vector<2x256xf32> to vector<2x64xf32>
    %116 = math.tanh %115 : vector<2x64xf32>
    %117 = vector.extract_strided_slice %114 {offsets = [0, 0], sizes = [2, 64], strides = [1, 1]} : vector<2x192xf32> to vector<2x64xf32>
    %118 = vector.extract_strided_slice %114 {offsets = [0, 64], sizes = [2, 64], strides = [1, 1]} : vector<2x192xf32> to vector<2x64xf32>
    %119 = vector.extract_strided_slice %114 {offsets = [0, 128], sizes = [2, 64], strides = [1, 1]} : vector<2x192xf32> to vector<2x64xf32>
    %120 = arith.mulf %118, %89 : vector<2x64xf32>
    %121 = arith.mulf %117, %116 : vector<2x64xf32>
    %122 = arith.addf %120, %121 : vector<2x64xf32>
    %123 = math.tanh %122 : vector<2x64xf32>
    %124 = arith.mulf %119, %123 : vector<2x64xf32>
    %125 = arith.index_cast %c2_i32_34 : i32 to index
    %c0_44 = arith.constant 0 : index
    %c0_45 = arith.constant 0 : index
    %126 = vector.load %arg8[%125, %c0_44, %c0_45] : memref<8x2x64xf32, #tpu.memory_space<vmem>>, vector<1x2x64xf32>
    %127 = vector.shape_cast %126 : vector<1x2x64xf32> to vector<2x64xf32>
    %128 = vector.shape_cast %124 : vector<2x64xf32> to vector<1x2x64xf32>
    tpu.vector_store %arg8[%125, %c0_44, %c0_45], %128 {strides = array<i32>} : memref<8x2x64xf32, #tpu.memory_space<vmem>>, vector<1x2x64xf32>,
    %c3_i32 = arith.constant 3 : i32
    %c7_i32_46 = arith.constant 7 : i32
    %129 = arith.subi %c7_i32_46, %c3_i32 : i32
    %c2_i32_47 = arith.constant 2 : i32
    %130 = arith.muli %c3_i32, %c2_i32_47 : i32
    %c2_i32_48 = arith.constant 2 : i32
    %131 = arith.muli %129, %c2_i32_48 : i32
    %c0_49 = arith.constant 0 : index
    %c0_50 = arith.constant 0 : index
    %132 = vector.load %arg2[%c0_49, %c0_50] : memref<64x256xf32, #tpu.memory_space<vmem>>, vector<64x256xf32>
    %cst_51 = arith.constant dense<0.000000e+00> : vector<2x256xf32>
    %133 = tpu.matmul %124, %132, %cst_51 {dimension_numbers = #tpu.dot_dimension_numbers<[1], [0], [0], [1], [0, 0, 1, 1], [], []>} : vector<2x64xf32>, vector<64x256xf32>, vector<2x256xf32> -> vector<2x256xf32>
    %134 = arith.index_cast %130 : i32 to index
    %c0_52 = arith.constant 0 : index
    %135 = vector.load %arg11[%134, %c0_52] : memref<16x256xbf16, #tpu.memory_space<vmem>>, vector<2x256xbf16>
    %136 = arith.extf %135 : vector<2x256xbf16> to vector<2x256xf32>
    %137 = arith.index_cast %131 : i32 to index
    %c0_53 = arith.constant 0 : index
    %138 = vector.load %arg11[%137, %c0_53] : memref<16x256xbf16, #tpu.memory_space<vmem>>, vector<2x256xbf16>
    %139 = arith.extf %138 : vector<2x256xbf16> to vector<2x256xf32>
    %140 = arith.select %27, %139, %136 : vector<2x256xi1>, vector<2x256xf32>
    %141 = arith.addf %133, %140 : vector<2x256xf32>
    %142 = vector.extract_strided_slice %141 {offsets = [0, 0], sizes = [2, 192], strides = [1, 1]} : vector<2x256xf32> to vector<2x192xf32>
    %143 = arith.negf %142 : vector<2x192xf32>
    %144 = math.exp %143 : vector<2x192xf32>
    %cst_54 = arith.constant 1.000000e+00 : f32
    %145 = vector.broadcast %cst_54 : f32 to vector<2x192xf32>
    %146 = arith.addf %145, %144 : vector<2x192xf32>
    %147 = arith.divf %145, %146 : vector<2x192xf32>
    %148 = vector.extract_strided_slice %141 {offsets = [0, 192], sizes = [2, 64], strides = [1, 1]} : vector<2x256xf32> to vector<2x64xf32>
    %149 = math.tanh %148 : vector<2x64xf32>
    %150 = vector.extract_strided_slice %147 {offsets = [0, 0], sizes = [2, 64], strides = [1, 1]} : vector<2x192xf32> to vector<2x64xf32>
    %151 = vector.extract_strided_slice %147 {offsets = [0, 64], sizes = [2, 64], strides = [1, 1]} : vector<2x192xf32> to vector<2x64xf32>
    %152 = vector.extract_strided_slice %147 {offsets = [0, 128], sizes = [2, 64], strides = [1, 1]} : vector<2x192xf32> to vector<2x64xf32>
    %153 = arith.mulf %151, %122 : vector<2x64xf32>
    %154 = arith.mulf %150, %149 : vector<2x64xf32>
    %155 = arith.addf %153, %154 : vector<2x64xf32>
    %156 = math.tanh %155 : vector<2x64xf32>
    %157 = arith.mulf %152, %156 : vector<2x64xf32>
    %158 = arith.index_cast %c3_i32 : i32 to index
    %c0_55 = arith.constant 0 : index
    %c0_56 = arith.constant 0 : index
    %159 = vector.load %arg8[%158, %c0_55, %c0_56] : memref<8x2x64xf32, #tpu.memory_space<vmem>>, vector<1x2x64xf32>
    %160 = vector.shape_cast %159 : vector<1x2x64xf32> to vector<2x64xf32>
    %161 = vector.shape_cast %157 : vector<2x64xf32> to vector<1x2x64xf32>
    tpu.vector_store %arg8[%158, %c0_55, %c0_56], %161 {strides = array<i32>} : memref<8x2x64xf32, #tpu.memory_space<vmem>>, vector<1x2x64xf32>,
    %c4_i32 = arith.constant 4 : i32
    %c7_i32_57 = arith.constant 7 : i32
    %162 = arith.subi %c7_i32_57, %c4_i32 : i32
    %c2_i32_58 = arith.constant 2 : i32
    %163 = arith.muli %c4_i32, %c2_i32_58 : i32
    %c2_i32_59 = arith.constant 2 : i32
    %164 = arith.muli %162, %c2_i32_59 : i32
    %c0_60 = arith.constant 0 : index
    %c0_61 = arith.constant 0 : index
    %165 = vector.load %arg2[%c0_60, %c0_61] : memref<64x256xf32, #tpu.memory_space<vmem>>, vector<64x256xf32>
    %cst_62 = arith.constant dense<0.000000e+00> : vector<2x256xf32>
    %166 = tpu.matmul %157, %165, %cst_62 {dimension_numbers = #tpu.dot_dimension_numbers<[1], [0], [0], [1], [0, 0, 1, 1], [], []>} : vector<2x64xf32>, vector<64x256xf32>, vector<2x256xf32> -> vector<2x256xf32>
    %167 = arith.index_cast %163 : i32 to index
    %c0_63 = arith.constant 0 : index
    %168 = vector.load %arg11[%167, %c0_63] : memref<16x256xbf16, #tpu.memory_space<vmem>>, vector<2x256xbf16>
    %169 = arith.extf %168 : vector<2x256xbf16> to vector<2x256xf32>
    %170 = arith.index_cast %164 : i32 to index
    %c0_64 = arith.constant 0 : index
    %171 = vector.load %arg11[%170, %c0_64] : memref<16x256xbf16, #tpu.memory_space<vmem>>, vector<2x256xbf16>
    %172 = arith.extf %171 : vector<2x256xbf16> to vector<2x256xf32>
    %173 = arith.select %27, %172, %169 : vector<2x256xi1>, vector<2x256xf32>
    %174 = arith.addf %166, %173 : vector<2x256xf32>
    %175 = vector.extract_strided_slice %174 {offsets = [0, 0], sizes = [2, 192], strides = [1, 1]} : vector<2x256xf32> to vector<2x192xf32>
    %176 = arith.negf %175 : vector<2x192xf32>
    %177 = math.exp %176 : vector<2x192xf32>
    %cst_65 = arith.constant 1.000000e+00 : f32
    %178 = vector.broadcast %cst_65 : f32 to vector<2x192xf32>
    %179 = arith.addf %178, %177 : vector<2x192xf32>
    %180 = arith.divf %178, %179 : vector<2x192xf32>
    %181 = vector.extract_strided_slice %174 {offsets = [0, 192], sizes = [2, 64], strides = [1, 1]} : vector<2x256xf32> to vector<2x64xf32>
    %182 = math.tanh %181 : vector<2x64xf32>
    %183 = vector.extract_strided_slice %180 {offsets = [0, 0], sizes = [2, 64], strides = [1, 1]} : vector<2x192xf32> to vector<2x64xf32>
    %184 = vector.extract_strided_slice %180 {offsets = [0, 64], sizes = [2, 64], strides = [1, 1]} : vector<2x192xf32> to vector<2x64xf32>
    %185 = vector.extract_strided_slice %180 {offsets = [0, 128], sizes = [2, 64], strides = [1, 1]} : vector<2x192xf32> to vector<2x64xf32>
    %186 = arith.mulf %184, %155 : vector<2x64xf32>
    %187 = arith.mulf %183, %182 : vector<2x64xf32>
    %188 = arith.addf %186, %187 : vector<2x64xf32>
    %189 = math.tanh %188 : vector<2x64xf32>
    %190 = arith.mulf %185, %189 : vector<2x64xf32>
    %191 = arith.index_cast %c4_i32 : i32 to index
    %c0_66 = arith.constant 0 : index
    %c0_67 = arith.constant 0 : index
    %192 = vector.load %arg8[%191, %c0_66, %c0_67] : memref<8x2x64xf32, #tpu.memory_space<vmem>>, vector<1x2x64xf32>
    %193 = vector.shape_cast %192 : vector<1x2x64xf32> to vector<2x64xf32>
    %194 = vector.shape_cast %190 : vector<2x64xf32> to vector<1x2x64xf32>
    tpu.vector_store %arg8[%191, %c0_66, %c0_67], %194 {strides = array<i32>} : memref<8x2x64xf32, #tpu.memory_space<vmem>>, vector<1x2x64xf32>,
    %c5_i32 = arith.constant 5 : i32
    %c7_i32_68 = arith.constant 7 : i32
    %195 = arith.subi %c7_i32_68, %c5_i32 : i32
    %c2_i32_69 = arith.constant 2 : i32
    %196 = arith.muli %c5_i32, %c2_i32_69 : i32
    %c2_i32_70 = arith.constant 2 : i32
    %197 = arith.muli %195, %c2_i32_70 : i32
    %c0_71 = arith.constant 0 : index
    %c0_72 = arith.constant 0 : index
    %198 = vector.load %arg2[%c0_71, %c0_72] : memref<64x256xf32, #tpu.memory_space<vmem>>, vector<64x256xf32>
    %cst_73 = arith.constant dense<0.000000e+00> : vector<2x256xf32>
    %199 = tpu.matmul %190, %198, %cst_73 {dimension_numbers = #tpu.dot_dimension_numbers<[1], [0], [0], [1], [0, 0, 1, 1], [], []>} : vector<2x64xf32>, vector<64x256xf32>, vector<2x256xf32> -> vector<2x256xf32>
    %200 = arith.index_cast %196 : i32 to index
    %c0_74 = arith.constant 0 : index
    %201 = vector.load %arg11[%200, %c0_74] : memref<16x256xbf16, #tpu.memory_space<vmem>>, vector<2x256xbf16>
    %202 = arith.extf %201 : vector<2x256xbf16> to vector<2x256xf32>
    %203 = arith.index_cast %197 : i32 to index
    %c0_75 = arith.constant 0 : index
    %204 = vector.load %arg11[%203, %c0_75] : memref<16x256xbf16, #tpu.memory_space<vmem>>, vector<2x256xbf16>
    %205 = arith.extf %204 : vector<2x256xbf16> to vector<2x256xf32>
    %206 = arith.select %27, %205, %202 : vector<2x256xi1>, vector<2x256xf32>
    %207 = arith.addf %199, %206 : vector<2x256xf32>
    %208 = vector.extract_strided_slice %207 {offsets = [0, 0], sizes = [2, 192], strides = [1, 1]} : vector<2x256xf32> to vector<2x192xf32>
    %209 = arith.negf %208 : vector<2x192xf32>
    %210 = math.exp %209 : vector<2x192xf32>
    %cst_76 = arith.constant 1.000000e+00 : f32
    %211 = vector.broadcast %cst_76 : f32 to vector<2x192xf32>
    %212 = arith.addf %211, %210 : vector<2x192xf32>
    %213 = arith.divf %211, %212 : vector<2x192xf32>
    %214 = vector.extract_strided_slice %207 {offsets = [0, 192], sizes = [2, 64], strides = [1, 1]} : vector<2x256xf32> to vector<2x64xf32>
    %215 = math.tanh %214 : vector<2x64xf32>
    %216 = vector.extract_strided_slice %213 {offsets = [0, 0], sizes = [2, 64], strides = [1, 1]} : vector<2x192xf32> to vector<2x64xf32>
    %217 = vector.extract_strided_slice %213 {offsets = [0, 64], sizes = [2, 64], strides = [1, 1]} : vector<2x192xf32> to vector<2x64xf32>
    %218 = vector.extract_strided_slice %213 {offsets = [0, 128], sizes = [2, 64], strides = [1, 1]} : vector<2x192xf32> to vector<2x64xf32>
    %219 = arith.mulf %217, %188 : vector<2x64xf32>
    %220 = arith.mulf %216, %215 : vector<2x64xf32>
    %221 = arith.addf %219, %220 : vector<2x64xf32>
    %222 = math.tanh %221 : vector<2x64xf32>
    %223 = arith.mulf %218, %222 : vector<2x64xf32>
    %224 = arith.index_cast %c5_i32 : i32 to index
    %c0_77 = arith.constant 0 : index
    %c0_78 = arith.constant 0 : index
    %225 = vector.load %arg8[%224, %c0_77, %c0_78] : memref<8x2x64xf32, #tpu.memory_space<vmem>>, vector<1x2x64xf32>
    %226 = vector.shape_cast %225 : vector<1x2x64xf32> to vector<2x64xf32>
    %227 = vector.shape_cast %223 : vector<2x64xf32> to vector<1x2x64xf32>
    tpu.vector_store %arg8[%224, %c0_77, %c0_78], %227 {strides = array<i32>} : memref<8x2x64xf32, #tpu.memory_space<vmem>>, vector<1x2x64xf32>,
    %c6_i32 = arith.constant 6 : i32
    %c7_i32_79 = arith.constant 7 : i32
    %228 = arith.subi %c7_i32_79, %c6_i32 : i32
    %c2_i32_80 = arith.constant 2 : i32
    %229 = arith.muli %c6_i32, %c2_i32_80 : i32
    %c2_i32_81 = arith.constant 2 : i32
    %230 = arith.muli %228, %c2_i32_81 : i32
    %c0_82 = arith.constant 0 : index
    %c0_83 = arith.constant 0 : index
    %231 = vector.load %arg2[%c0_82, %c0_83] : memref<64x256xf32, #tpu.memory_space<vmem>>, vector<64x256xf32>
    %cst_84 = arith.constant dense<0.000000e+00> : vector<2x256xf32>
    %232 = tpu.matmul %223, %231, %cst_84 {dimension_numbers = #tpu.dot_dimension_numbers<[1], [0], [0], [1], [0, 0, 1, 1], [], []>} : vector<2x64xf32>, vector<64x256xf32>, vector<2x256xf32> -> vector<2x256xf32>
    %233 = arith.index_cast %229 : i32 to index
    %c0_85 = arith.constant 0 : index
    %234 = vector.load %arg11[%233, %c0_85] : memref<16x256xbf16, #tpu.memory_space<vmem>>, vector<2x256xbf16>
    %235 = arith.extf %234 : vector<2x256xbf16> to vector<2x256xf32>
    %236 = arith.index_cast %230 : i32 to index
    %c0_86 = arith.constant 0 : index
    %237 = vector.load %arg11[%236, %c0_86] : memref<16x256xbf16, #tpu.memory_space<vmem>>, vector<2x256xbf16>
    %238 = arith.extf %237 : vector<2x256xbf16> to vector<2x256xf32>
    %239 = arith.select %27, %238, %235 : vector<2x256xi1>, vector<2x256xf32>
    %240 = arith.addf %232, %239 : vector<2x256xf32>
    %241 = vector.extract_strided_slice %240 {offsets = [0, 0], sizes = [2, 192], strides = [1, 1]} : vector<2x256xf32> to vector<2x192xf32>
    %242 = arith.negf %241 : vector<2x192xf32>
    %243 = math.exp %242 : vector<2x192xf32>
    %cst_87 = arith.constant 1.000000e+00 : f32
    %244 = vector.broadcast %cst_87 : f32 to vector<2x192xf32>
    %245 = arith.addf %244, %243 : vector<2x192xf32>
    %246 = arith.divf %244, %245 : vector<2x192xf32>
    %247 = vector.extract_strided_slice %240 {offsets = [0, 192], sizes = [2, 64], strides = [1, 1]} : vector<2x256xf32> to vector<2x64xf32>
    %248 = math.tanh %247 : vector<2x64xf32>
    %249 = vector.extract_strided_slice %246 {offsets = [0, 0], sizes = [2, 64], strides = [1, 1]} : vector<2x192xf32> to vector<2x64xf32>
    %250 = vector.extract_strided_slice %246 {offsets = [0, 64], sizes = [2, 64], strides = [1, 1]} : vector<2x192xf32> to vector<2x64xf32>
    %251 = vector.extract_strided_slice %246 {offsets = [0, 128], sizes = [2, 64], strides = [1, 1]} : vector<2x192xf32> to vector<2x64xf32>
    %252 = arith.mulf %250, %221 : vector<2x64xf32>
    %253 = arith.mulf %249, %248 : vector<2x64xf32>
    %254 = arith.addf %252, %253 : vector<2x64xf32>
    %255 = math.tanh %254 : vector<2x64xf32>
    %256 = arith.mulf %251, %255 : vector<2x64xf32>
    %257 = arith.index_cast %c6_i32 : i32 to index
    %c0_88 = arith.constant 0 : index
    %c0_89 = arith.constant 0 : index
    %258 = vector.load %arg8[%257, %c0_88, %c0_89] : memref<8x2x64xf32, #tpu.memory_space<vmem>>, vector<1x2x64xf32>
    %259 = vector.shape_cast %258 : vector<1x2x64xf32> to vector<2x64xf32>
    %260 = vector.shape_cast %256 : vector<2x64xf32> to vector<1x2x64xf32>
    tpu.vector_store %arg8[%257, %c0_88, %c0_89], %260 {strides = array<i32>} : memref<8x2x64xf32, #tpu.memory_space<vmem>>, vector<1x2x64xf32>,
    %c7_i32_90 = arith.constant 7 : i32
    %c7_i32_91 = arith.constant 7 : i32
    %261 = arith.subi %c7_i32_91, %c7_i32_90 : i32
    %c2_i32_92 = arith.constant 2 : i32
    %262 = arith.muli %c7_i32_90, %c2_i32_92 : i32
    %c2_i32_93 = arith.constant 2 : i32
    %263 = arith.muli %261, %c2_i32_93 : i32
    %c0_94 = arith.constant 0 : index
    %c0_95 = arith.constant 0 : index
    %264 = vector.load %arg2[%c0_94, %c0_95] : memref<64x256xf32, #tpu.memory_space<vmem>>, vector<64x256xf32>
    %cst_96 = arith.constant dense<0.000000e+00> : vector<2x256xf32>
    %265 = tpu.matmul %256, %264, %cst_96 {dimension_numbers = #tpu.dot_dimension_numbers<[1], [0], [0], [1], [0, 0, 1, 1], [], []>} : vector<2x64xf32>, vector<64x256xf32>, vector<2x256xf32> -> vector<2x256xf32>
    %266 = arith.index_cast %262 : i32 to index
    %c0_97 = arith.constant 0 : index
    %267 = vector.load %arg11[%266, %c0_97] : memref<16x256xbf16, #tpu.memory_space<vmem>>, vector<2x256xbf16>
    %268 = arith.extf %267 : vector<2x256xbf16> to vector<2x256xf32>
    %269 = arith.index_cast %263 : i32 to index
    %c0_98 = arith.constant 0 : index
    %270 = vector.load %arg11[%269, %c0_98] : memref<16x256xbf16, #tpu.memory_space<vmem>>, vector<2x256xbf16>
    %271 = arith.extf %270 : vector<2x256xbf16> to vector<2x256xf32>
    %272 = arith.select %27, %271, %268 : vector<2x256xi1>, vector<2x256xf32>
    %273 = arith.addf %265, %272 : vector<2x256xf32>
    %274 = vector.extract_strided_slice %273 {offsets = [0, 0], sizes = [2, 192], strides = [1, 1]} : vector<2x256xf32> to vector<2x192xf32>
    %275 = arith.negf %274 : vector<2x192xf32>
    %276 = math.exp %275 : vector<2x192xf32>
    %cst_99 = arith.constant 1.000000e+00 : f32
    %277 = vector.broadcast %cst_99 : f32 to vector<2x192xf32>
    %278 = arith.addf %277, %276 : vector<2x192xf32>
    %279 = arith.divf %277, %278 : vector<2x192xf32>
    %280 = vector.extract_strided_slice %273 {offsets = [0, 192], sizes = [2, 64], strides = [1, 1]} : vector<2x256xf32> to vector<2x64xf32>
    %281 = math.tanh %280 : vector<2x64xf32>
    %282 = vector.extract_strided_slice %279 {offsets = [0, 0], sizes = [2, 64], strides = [1, 1]} : vector<2x192xf32> to vector<2x64xf32>
    %283 = vector.extract_strided_slice %279 {offsets = [0, 64], sizes = [2, 64], strides = [1, 1]} : vector<2x192xf32> to vector<2x64xf32>
    %284 = vector.extract_strided_slice %279 {offsets = [0, 128], sizes = [2, 64], strides = [1, 1]} : vector<2x192xf32> to vector<2x64xf32>
    %285 = arith.mulf %283, %254 : vector<2x64xf32>
    %286 = arith.mulf %282, %281 : vector<2x64xf32>
    %287 = arith.addf %285, %286 : vector<2x64xf32>
    %288 = math.tanh %287 : vector<2x64xf32>
    %289 = arith.mulf %284, %288 : vector<2x64xf32>
    %290 = arith.index_cast %c7_i32_90 : i32 to index
    %c0_100 = arith.constant 0 : index
    %c0_101 = arith.constant 0 : index
    %291 = vector.load %arg8[%290, %c0_100, %c0_101] : memref<8x2x64xf32, #tpu.memory_space<vmem>>, vector<1x2x64xf32>
    %292 = vector.shape_cast %291 : vector<1x2x64xf32> to vector<2x64xf32>
    %293 = vector.shape_cast %289 : vector<2x64xf32> to vector<1x2x64xf32>
    tpu.vector_store %arg8[%290, %c0_100, %c0_101], %293 {strides = array<i32>} : memref<8x2x64xf32, #tpu.memory_space<vmem>>, vector<1x2x64xf32>,
    %c8_i32 = arith.constant 8 : i32
    %294 = tpu.iota {dimensions = array<i32: 1>} : vector<2x64xi32>
    %c32_i32_102 = arith.constant 32 : i32
    %295 = vector.broadcast %c32_i32_102 : i32 to vector<2x64xi32>
    %296 = arith.cmpi slt, %294, %295 : vector<2x64xi32>
    %c0_i32_103 = arith.constant 0 : i32
    %c7_i32_104 = arith.constant 7 : i32
    %297 = arith.subi %c7_i32_104, %c0_i32_103 : i32
    %298 = arith.index_cast %c0_i32_103 : i32 to index
    %c0_105 = arith.constant 0 : index
    %c0_106 = arith.constant 0 : index
    %299 = vector.load %arg8[%298, %c0_105, %c0_106] : memref<8x2x64xf32, #tpu.memory_space<vmem>>, vector<1x2x64xf32>
    %300 = vector.shape_cast %299 : vector<1x2x64xf32> to vector<2x64xf32>
    %301 = arith.index_cast %297 : i32 to index
    %c0_107 = arith.constant 0 : index
    %c0_108 = arith.constant 0 : index
    %302 = vector.load %arg8[%301, %c0_107, %c0_108] : memref<8x2x64xf32, #tpu.memory_space<vmem>>, vector<1x2x64xf32>
    %303 = vector.shape_cast %302 : vector<1x2x64xf32> to vector<2x64xf32>
    %304 = arith.select %296, %300, %303 : vector<2x64xi1>, vector<2x64xf32>
    %305 = arith.index_cast %c0_i32_103 : i32 to index
    %c0_109 = arith.constant 0 : index
    %c0_110 = arith.constant 0 : index
    %306 = vector.load %arg8[%305, %c0_109, %c0_110] : memref<8x2x64xf32, #tpu.memory_space<vmem>>, vector<1x2x64xf32>
    %307 = vector.shape_cast %306 : vector<1x2x64xf32> to vector<2x64xf32>
    %308 = vector.shape_cast %304 : vector<2x64xf32> to vector<1x2x64xf32>
    tpu.vector_store %arg8[%305, %c0_109, %c0_110], %308 {strides = array<i32>} : memref<8x2x64xf32, #tpu.memory_space<vmem>>, vector<1x2x64xf32>,
    %309 = arith.select %296, %303, %300 : vector<2x64xi1>, vector<2x64xf32>
    %310 = arith.index_cast %297 : i32 to index
    %c0_111 = arith.constant 0 : index
    %c0_112 = arith.constant 0 : index
    %311 = vector.load %arg8[%310, %c0_111, %c0_112] : memref<8x2x64xf32, #tpu.memory_space<vmem>>, vector<1x2x64xf32>
    %312 = vector.shape_cast %311 : vector<1x2x64xf32> to vector<2x64xf32>
    %313 = vector.shape_cast %309 : vector<2x64xf32> to vector<1x2x64xf32>
    tpu.vector_store %arg8[%310, %c0_111, %c0_112], %313 {strides = array<i32>} : memref<8x2x64xf32, #tpu.memory_space<vmem>>, vector<1x2x64xf32>,
    %c1_i32_113 = arith.constant 1 : i32
    %c7_i32_114 = arith.constant 7 : i32
    %314 = arith.subi %c7_i32_114, %c1_i32_113 : i32
    %315 = arith.index_cast %c1_i32_113 : i32 to index
    %c0_115 = arith.constant 0 : index
    %c0_116 = arith.constant 0 : index
    %316 = vector.load %arg8[%315, %c0_115, %c0_116] : memref<8x2x64xf32, #tpu.memory_space<vmem>>, vector<1x2x64xf32>
    %317 = vector.shape_cast %316 : vector<1x2x64xf32> to vector<2x64xf32>
    %318 = arith.index_cast %314 : i32 to index
    %c0_117 = arith.constant 0 : index
    %c0_118 = arith.constant 0 : index
    %319 = vector.load %arg8[%318, %c0_117, %c0_118] : memref<8x2x64xf32, #tpu.memory_space<vmem>>, vector<1x2x64xf32>
    %320 = vector.shape_cast %319 : vector<1x2x64xf32> to vector<2x64xf32>
    %321 = arith.select %296, %317, %320 : vector<2x64xi1>, vector<2x64xf32>
    %322 = arith.index_cast %c1_i32_113 : i32 to index
    %c0_119 = arith.constant 0 : index
    %c0_120 = arith.constant 0 : index
    %323 = vector.load %arg8[%322, %c0_119, %c0_120] : memref<8x2x64xf32, #tpu.memory_space<vmem>>, vector<1x2x64xf32>
    %324 = vector.shape_cast %323 : vector<1x2x64xf32> to vector<2x64xf32>
    %325 = vector.shape_cast %321 : vector<2x64xf32> to vector<1x2x64xf32>
    tpu.vector_store %arg8[%322, %c0_119, %c0_120], %325 {strides = array<i32>} : memref<8x2x64xf32, #tpu.memory_space<vmem>>, vector<1x2x64xf32>,
    %326 = arith.select %296, %320, %317 : vector<2x64xi1>, vector<2x64xf32>
    %327 = arith.index_cast %314 : i32 to index
    %c0_121 = arith.constant 0 : index
    %c0_122 = arith.constant 0 : index
    %328 = vector.load %arg8[%327, %c0_121, %c0_122] : memref<8x2x64xf32, #tpu.memory_space<vmem>>, vector<1x2x64xf32>
    %329 = vector.shape_cast %328 : vector<1x2x64xf32> to vector<2x64xf32>
    %330 = vector.shape_cast %326 : vector<2x64xf32> to vector<1x2x64xf32>
    tpu.vector_store %arg8[%327, %c0_121, %c0_122], %330 {strides = array<i32>} : memref<8x2x64xf32, #tpu.memory_space<vmem>>, vector<1x2x64xf32>,
    %c2_i32_123 = arith.constant 2 : i32
    %c7_i32_124 = arith.constant 7 : i32
    %331 = arith.subi %c7_i32_124, %c2_i32_123 : i32
    %332 = arith.index_cast %c2_i32_123 : i32 to index
    %c0_125 = arith.constant 0 : index
    %c0_126 = arith.constant 0 : index
    %333 = vector.load %arg8[%332, %c0_125, %c0_126] : memref<8x2x64xf32, #tpu.memory_space<vmem>>, vector<1x2x64xf32>
    %334 = vector.shape_cast %333 : vector<1x2x64xf32> to vector<2x64xf32>
    %335 = arith.index_cast %331 : i32 to index
    %c0_127 = arith.constant 0 : index
    %c0_128 = arith.constant 0 : index
    %336 = vector.load %arg8[%335, %c0_127, %c0_128] : memref<8x2x64xf32, #tpu.memory_space<vmem>>, vector<1x2x64xf32>
    %337 = vector.shape_cast %336 : vector<1x2x64xf32> to vector<2x64xf32>
    %338 = arith.select %296, %334, %337 : vector<2x64xi1>, vector<2x64xf32>
    %339 = arith.index_cast %c2_i32_123 : i32 to index
    %c0_129 = arith.constant 0 : index
    %c0_130 = arith.constant 0 : index
    %340 = vector.load %arg8[%339, %c0_129, %c0_130] : memref<8x2x64xf32, #tpu.memory_space<vmem>>, vector<1x2x64xf32>
    %341 = vector.shape_cast %340 : vector<1x2x64xf32> to vector<2x64xf32>
    %342 = vector.shape_cast %338 : vector<2x64xf32> to vector<1x2x64xf32>
    tpu.vector_store %arg8[%339, %c0_129, %c0_130], %342 {strides = array<i32>} : memref<8x2x64xf32, #tpu.memory_space<vmem>>, vector<1x2x64xf32>,
    %343 = arith.select %296, %337, %334 : vector<2x64xi1>, vector<2x64xf32>
    %344 = arith.index_cast %331 : i32 to index
    %c0_131 = arith.constant 0 : index
    %c0_132 = arith.constant 0 : index
    %345 = vector.load %arg8[%344, %c0_131, %c0_132] : memref<8x2x64xf32, #tpu.memory_space<vmem>>, vector<1x2x64xf32>
    %346 = vector.shape_cast %345 : vector<1x2x64xf32> to vector<2x64xf32>
    %347 = vector.shape_cast %343 : vector<2x64xf32> to vector<1x2x64xf32>
    tpu.vector_store %arg8[%344, %c0_131, %c0_132], %347 {strides = array<i32>} : memref<8x2x64xf32, #tpu.memory_space<vmem>>, vector<1x2x64xf32>,
    %c3_i32_133 = arith.constant 3 : i32
    %c7_i32_134 = arith.constant 7 : i32
    %348 = arith.subi %c7_i32_134, %c3_i32_133 : i32
    %349 = arith.index_cast %c3_i32_133 : i32 to index
    %c0_135 = arith.constant 0 : index
    %c0_136 = arith.constant 0 : index
    %350 = vector.load %arg8[%349, %c0_135, %c0_136] : memref<8x2x64xf32, #tpu.memory_space<vmem>>, vector<1x2x64xf32>
    %351 = vector.shape_cast %350 : vector<1x2x64xf32> to vector<2x64xf32>
    %352 = arith.index_cast %348 : i32 to index
    %c0_137 = arith.constant 0 : index
    %c0_138 = arith.constant 0 : index
    %353 = vector.load %arg8[%352, %c0_137, %c0_138] : memref<8x2x64xf32, #tpu.memory_space<vmem>>, vector<1x2x64xf32>
    %354 = vector.shape_cast %353 : vector<1x2x64xf32> to vector<2x64xf32>
    %355 = arith.select %296, %351, %354 : vector<2x64xi1>, vector<2x64xf32>
    %356 = arith.index_cast %c3_i32_133 : i32 to index
    %c0_139 = arith.constant 0 : index
    %c0_140 = arith.constant 0 : index
    %357 = vector.load %arg8[%356, %c0_139, %c0_140] : memref<8x2x64xf32, #tpu.memory_space<vmem>>, vector<1x2x64xf32>
    %358 = vector.shape_cast %357 : vector<1x2x64xf32> to vector<2x64xf32>
    %359 = vector.shape_cast %355 : vector<2x64xf32> to vector<1x2x64xf32>
    tpu.vector_store %arg8[%356, %c0_139, %c0_140], %359 {strides = array<i32>} : memref<8x2x64xf32, #tpu.memory_space<vmem>>, vector<1x2x64xf32>,
    %360 = arith.select %296, %354, %351 : vector<2x64xi1>, vector<2x64xf32>
    %361 = arith.index_cast %348 : i32 to index
    %c0_141 = arith.constant 0 : index
    %c0_142 = arith.constant 0 : index
    %362 = vector.load %arg8[%361, %c0_141, %c0_142] : memref<8x2x64xf32, #tpu.memory_space<vmem>>, vector<1x2x64xf32>
    %363 = vector.shape_cast %362 : vector<1x2x64xf32> to vector<2x64xf32>
    %364 = vector.shape_cast %360 : vector<2x64xf32> to vector<1x2x64xf32>
    tpu.vector_store %arg8[%361, %c0_141, %c0_142], %364 {strides = array<i32>} : memref<8x2x64xf32, #tpu.memory_space<vmem>>, vector<1x2x64xf32>,
    %c4_i32_143 = arith.constant 4 : i32
    %c0_144 = arith.constant 0 : index
    %c0_145 = arith.constant 0 : index
    %365 = vector.load %arg4[%c0_144, %c0_145] : memref<64x32xf32, #tpu.memory_space<vmem>>, vector<64x32xf32>
    %cst_146 = arith.constant dense<0.000000e+00> : vector<2x32xf32>
    %366 = tpu.matmul %289, %365, %cst_146 {dimension_numbers = #tpu.dot_dimension_numbers<[1], [0], [0], [1], [0, 0, 1, 1], [], []>} : vector<2x64xf32>, vector<64x32xf32>, vector<2x32xf32> -> vector<2x32xf32>
    %c0_147 = arith.constant 0 : index
    %c0_148 = arith.constant 0 : index
    %367 = vector.load %arg5[%c0_147, %c0_148] : memref<1x32xf32, #tpu.memory_space<vmem>>, vector<1x32xf32>
    %368 = vector.broadcast %367 : vector<1x32xf32> to vector<2x32xf32>
    %369 = arith.addf %366, %368 : vector<2x32xf32>
    %370 = math.tanh %369 : vector<2x32xf32>
    %c0_149 = arith.constant 0 : index
    %c0_150 = arith.constant 0 : index
    %371 = vector.load %arg9[%c0_149, %c0_150] : memref<2x32xf32, #tpu.memory_space<vmem>>, vector<2x32xf32>
    tpu.vector_store %arg9[%c0_149, %c0_150], %370 {strides = array<i32>} : memref<2x32xf32, #tpu.memory_space<vmem>>, vector<2x32xf32>,
    %c0_151 = arith.constant 0 : index
    %c0_152 = arith.constant 0 : index
    %372 = vector.load %arg6[%c0_151, %c0_152] : memref<64x32xf32, #tpu.memory_space<vmem>>, vector<64x32xf32>
    %cst_153 = arith.constant dense<0.000000e+00> : vector<2x32xf32>
    %373 = tpu.matmul %287, %372, %cst_153 {dimension_numbers = #tpu.dot_dimension_numbers<[1], [0], [0], [1], [0, 0, 1, 1], [], []>} : vector<2x64xf32>, vector<64x32xf32>, vector<2x32xf32> -> vector<2x32xf32>
    %c0_154 = arith.constant 0 : index
    %c0_155 = arith.constant 0 : index
    %374 = vector.load %arg7[%c0_154, %c0_155] : memref<1x32xf32, #tpu.memory_space<vmem>>, vector<1x32xf32>
    %375 = vector.broadcast %374 : vector<1x32xf32> to vector<2x32xf32>
    %376 = arith.addf %373, %375 : vector<2x32xf32>
    %377 = math.tanh %376 : vector<2x32xf32>
    %c0_156 = arith.constant 0 : index
    %c0_157 = arith.constant 0 : index
    %378 = vector.load %arg10[%c0_156, %c0_157] : memref<2x32xf32, #tpu.memory_space<vmem>>, vector<2x32xf32>
    tpu.vector_store %arg10[%c0_156, %c0_157], %377 {strides = array<i32>} : memref<2x32xf32, #tpu.memory_space<vmem>>, vector<2x32xf32>,
    return
  }
}

</mosaic_0001>

<bundles_post_ra>
// kernel: encoder_forward.1
= control target key start
LH: loop header
LB: loop body
LE: loop exit
PB: predicated region body
PF: predicated region fallthrough
CT: control target
= control target key end

     0   :  { %16 = vsyncpa [#allocation4], 0  ;;  %v2026_v2 = vmov 0   ;;  %v2027_v4 = vmov 0.0   ;;  %vm78_vm0 = vcmask 261120   ;;  %s2501_s0 = inlined_call_operand.vmem [shape: bf16[16,32], index: 0, kind: input, shape index: {}]   ;;  %s2502_s1 = inlined_call_operand.vmem [shape: bf16[32,256], index: 1, kind: input, shape index: {}]   ;;  %s2503_s2 = inlined_call_operand.vmem [shape: f32[64,256], index: 2, kind: input, shape index: {}]   ;;  %s2504_s3 = inlined_call_operand.vmem [shape: f32[1,256], index: 3, kind: input, shape index: {}]   ;;  %s2505_s4 = inlined_call_operand.vmem [shape: f32[64,32], index: 4, kind: input, shape index: {}]   ;;  %s2506_s5 = inlined_call_operand.vmem [shape: f32[1,32], index: 5, kind: input, shape index: {}]   ;;  %s2507_s6 = inlined_call_operand.vmem [shape: f32[64,32], index: 6, kind: input, shape index: {}]   ;;  %s2508_s7 = inlined_call_operand.vmem [shape: f32[1,32], index: 7, kind: input, shape index: {}]   ;;  %s2509_s8 = inlined_call_operand.hbm [shape: f32[8,2,64], index: 8, kind: output, shape index: {0}]   ;;  %s2510_s9 = inlined_call_operand.hbm [shape: f32[2,32], index: 9, kind: output, shape index: {1}]   ;;  %s2511_s10 = inlined_call_operand.hbm [shape: f32[2,32], index: 10, kind: output, shape index: {2}]  }
   0x1   :  { %v1849_v0 = vld [vmem:[%s2502_s1 + $0x4] ss:$8 sps:$4 sm:$0xff]   ;;  %v1851_v1 = vld [vmem:[%s2502_s1] ss:$8 sps:$4 sm:$0xff]   ;;  %114 = vmatprep.mubr.bf16.mxu0 %v2026_v2  ;;  %v1852_v3 = vld [vmem:[%s2502_s1 + $0x14] ss:$8 sps:$4 sm:$0xff]   ;;  %270 = vmatprep.mubr.f32.mxu1 %v2027_v4 }
   0x2   :  { %82 = vmatprep.subr.bf16.mxu0 %v1849_v0  ;;  %v1854_v5 = vld [vmem:[%s2502_s1 + $0x10] ss:$8 sps:$4 sm:$0xff]   ;;  %v159_v6 = vld [vmem:[%s2503_s2 + $0x8] sm:$0xff]  ;;  %v1855_v7 = vld [vmem:[%s2501_s0] sm:$0xff]  }
   0x3   :  { %83 = vmatpush1.bf16.msra.mxu0 %v1851_v1  ;;  %v161_v8 = vld [vmem:[%s2503_s2 + $0x18] sm:$0xff]  ;;  %v158_v9 = vld [vmem:[%s2503_s2] sm:$0xff]  ;;  %v160_v10 = vld [vmem:[%s2503_s2 + $0x10] sm:$0xff] }
   0x4   :  { %84 = vmatprep.subr.bf16.mxu0 %v1852_v3  ;;  %v2119_v11 = vpack.c.bf16 %v161_v8, %v159_v6  ;;  %v2121_v12 = vpack.c.bf16 %v160_v10, %v158_v9  ;;  %v163_v13 = vld [vmem:[%s2503_s2 + $0x28] sm:$0xff]  ;;  %v165_v14 = vld [vmem:[%s2503_s2 + $0x38] sm:$0xff]  ;;  %v162_v15 = vld [vmem:[%s2503_s2 + $0x20] sm:$0xff] }
   0x5   :  { %v2132_v16 = vpack.c.bf16 %v165_v14, %v163_v13  ;;  %v164_v17 = vld [vmem:[%s2503_s2 + $0x30] sm:$0xff]  ;;  %v167_v18 = vld [vmem:[%s2503_s2 + $0x48] sm:$0xff]  ;;  %v169_v19 = vld [vmem:[%s2503_s2 + $0x58] sm:$0xff] }
   0x6   :  { %1688 = vmatprep.subr.bf16.mxu1 %v2119_v11  ;;  %v2145_v20 = vpack.c.bf16 %v164_v17, %v162_v15  ;;  %v2149_v21 = vpack.c.bf16 %v169_v19, %v167_v18  ;;  %v166_v22 = vld [vmem:[%s2503_s2 + $0x40] sm:$0xff]  ;;  %v168_v23 = vld [vmem:[%s2503_s2 + $0x50] sm:$0xff] }
   0x7   :  { %85 = vmatpush1.bf16.msra.mxu0 %v1854_v5  ;;  %1690 = vmatpush1.bf16.msra.mxu1 %v2121_v12 }
   0x8   :  { %1704 = vmatprep.subr.bf16.mxu0 %v2119_v11  ;;  %1692 = vmatprep.subr.bf16.mxu1 %v2132_v16 }
   0x9   :  { %17 = vsyncpa [#allocation6], 0  ;;  %v171_v24 = vld [vmem:[%s2503_s2 + $0x68] sm:$0xff]  ;;  %v173_v25 = vld [vmem:[%s2503_s2 + $0x78] sm:$0xff]  ;;  %v2166_v26 = vpack.c.bf16 %v168_v23, %v166_v22  ;;  %v37_v31 = vlaneseq  ;;  %vm307_vm3 = vcmask 517120   ;;  %vm202_vm4 = vcmask 523264  }
   0xa   :  { %1603 = vmatmul.mubr.msk.bf16.vlgmr.msra.gmra.mrb[0].mxu0 %vm78_vm0, %v1855_v7  ;;  %v2170_v27 = vpack.c.bf16 %v173_v25, %v171_v24  ;;  %v170_v28 = vld [vmem:[%s2503_s2 + $0x60] sm:$0xff]  ;;  %v172_v29 = vld [vmem:[%s2503_s2 + $0x70] sm:$0xff]  ;;  %vm2030_vm6 = vmmov 0  }
   0xb   :  { %1706 = vmatpush1.bf16.msra.mxu0 %v2121_v12  ;;  %420 = vmatprep.mubr.f32.mxu0 %v2027_v4  ;;  %v2180_v30 = vpack.c.bf16 %v172_v29, %v170_v28  ;;  %v38_v32 = vshrl.u32 %v37_v31, 7  ;;  %v35_v34 = vld [vmem:[%s2504_s3] sm:$0x3]  ;;  %v2203_v46 = vand.u32 127, %v37_v31  ;;  %s2028_s3 = smov 64  }
   0xc   :  { %1694 = vmatpush1.bf16.msra.mxu1 %v2145_v20  ;;  %1708 = vmatprep.subr.bf16.mxu0 %v2132_v16  ;;  %v1463_v63 = vld [vmem:[%s2507_s6] sm:$0xff] }
   0xd   :  { %1696 = vmatprep.subr.bf16.mxu1 %v2149_v21  ;;  %v39_v33 = vsub.s32 0, %v38_v32  ;;  %v43_v35 = vsub.s32 1, %v38_v32  ;;  %v131_v49 = vadd.s32 128, %v2203_v46  ;;  %v136_v50 = vand.u32 63, %v2203_v46 }
   0xe   :  { %vm1347_vm5 = vcmp.lt.s32.totalorder %v2203_v46, 32 }
   0xf   :  { %1710 = vmatpush1.bf16.msra.mxu0 %v2145_v20  ;;  %v40_v36 = vrot.slane %v35_v34, %v39_v33  ;;  %v44_v38 = vrot.slane %v35_v34, %v43_v35  ;;  %v143_v51 = vand.u32 63, %v131_v49  ;;  %vm2207_vm1 = vcmp.ge.s32.totalorder %v136_v50, 32 }
  0x10   :  { %1698 = vmatpush1.bf16.msra.mxu1 %v2166_v26  ;;  %1712 = vmatprep.subr.bf16.mxu0 %v2149_v21 }
  0x11   :  { %1700 = vmatprep.subr.bf16.mxu1 %v2170_v27  ;;  %vm2211_vm2 = vcmp.ge.s32.totalorder %v143_v51, 32 }
  0x13   :  { %1714 = vmatpush1.bf16.msra.mxu0 %v2166_v26 }
  0x14   :  { %1702 = vmatpush1.bf16.msra.mxu1 %v2180_v30  ;;  %1716 = vmatprep.subr.bf16.mxu0 %v2170_v27 }
  0x15   :  { %1720 = vmatprep.subr.bf16.mxu1 %v2119_v11 }
  0x17   :  { %271 = vmatmul.mubr.f32.vlgmr.msra.gmra.mrb[0].mxu1 %v2027_v4  ;;  %1718 = vmatpush1.bf16.msra.mxu0 %v2180_v30 }
  0x18   :  { %1722 = vmatpush1.bf16.msra.mxu1 %v2121_v12  ;;  %570 = vmatprep.mubr.f32.mxu1 %v2027_v4 }
  0x19   :  { %1724 = vmatprep.subr.bf16.mxu1 %v2132_v16  ;;  %1736 = vmatprep.subr.bf16.mxu0 %v2119_v11 }
  0x1c   :  { %1726 = vmatpush1.bf16.msra.mxu1 %v2145_v20 }
  0x1d   :  { %1728 = vmatprep.subr.bf16.mxu1 %v2149_v21 }
  0x20   :  { %1730 = vmatpush1.bf16.msra.mxu1 %v2166_v26 }
  0x21   :  { %1732 = vmatprep.subr.bf16.mxu1 %v2170_v27 }
  0x24   :  { %1734 = vmatpush1.bf16.msra.mxu1 %v2180_v30 }
  0x25   :  { %1752 = vmatprep.subr.bf16.mxu1 %v2119_v11 }
  0xdd   :  { %v116_v37 = vpop.f32.mrb[0].mxu0 }
  0xde   :  { %v118_v39 = vpop.f32.mrb[1].mxu0  ;;  %v117_v41 = vadd.f32 %v116_v37, %v40_v36 }
  0xdf   :  { %v120_v40 = vpop.f32.mrb[2].mxu0  ;;  %v119_v44 = vadd.f32 %v118_v39, %v44_v38 }
  0xe0   :  { %v121_v42 = vadd.f32 %v120_v40, %v40_v36  ;;  %v122_v43 = vpop.f32.mrb[3].mxu0 }
  0xe1   :  { %v123_v45 = vadd.f32 %v122_v43, %v44_v38 }
  0xe2   :  { %v125_v47 = vpack.c.bf16 %v121_v42, %v117_v41 }
  0xe3   :  { %v126_v48 = vpack.c.bf16 %v123_v45, %v119_v44 }
  0xe4   :  { %127 = vst [vmem:[#allocation2] sm:$0xff] %v125_v47 }
  0xe5   :  { %128 = vst [vmem:[#allocation2 + $0x8] sm:$0xff] %v126_v48 }
  0xea   :  { %v272_v52 = vpop.f32.mrb[0].mxu1 }
  0xeb   :  { %v174_v53 = vld [vmem:[#allocation2] sm:$0x1]  ;;  %v178_v54 = vld [vmem:[#allocation2] sm:$0x80]  ;;  %v274_v55 = vpop.f32.mrb[1].mxu1 }
  0xec   :  { %v176_v56 = vunpack.c.l.bf16 %v174_v53  ;;  %v182_v57 = vrot.slane %v178_v54, 4  ;;  %v175_v58 = vld [vmem:[#allocation2 + $0x8] sm:$0x1]  ;;  %v179_v59 = vld [vmem:[#allocation2 + $0x8] sm:$0x80] }
  0xed   :  { %v177_v61 = vunpack.c.l.bf16 %v175_v58  ;;  %v183_v62 = vrot.slane %v179_v59, 4  ;;  %v325_v36 = vld [vmem:[#allocation2] sm:$0x2]  ;;  %v329_v37 = vld [vmem:[#allocation2] sm:$0x40] }
  0xee   :  { %v186_v0 = vunpack.c.l.bf16 %v182_v57  ;;  %v190_v1 = vrot.slane %v176_v56, 2  ;;  %v326_v38 = vld [vmem:[#allocation2 + $0x8] sm:$0x2]  ;;  %v330_v39 = vld [vmem:[#allocation2 + $0x8] sm:$0x40]  ;;  %v327_v40 = vunpack.c.l.bf16 %v325_v36  ;;  %v333_v41 = vrot.slane %v329_v37, 4 }
  0xef   :  { %v187_v2 = vunpack.c.l.bf16 %v183_v62  ;;  %v191_v3 = vrot.slane %v177_v61, 2  ;;  %v328_v42 = vunpack.c.l.bf16 %v326_v38  ;;  %v334_v43 = vrot.slane %v330_v39, 4 }
  0xf0   :  { %v194_v5 = vsel %vm2207_vm1, %v186_v0, %v190_v1  ;;  %v337_v44 = vunpack.c.l.bf16 %v333_v41  ;;  %v341_v45 = vrot.slane %v327_v40, 6 }
  0xf1   :  { %v198_v6 = vrot.slane %v194_v5, 6  ;;  %v195_v7 = vsel %vm2211_vm2, %v187_v2, %v191_v3  ;;  %v338_v47 = vunpack.c.l.bf16 %v334_v43  ;;  %v342_v48 = vrot.slane %v328_v42, 6 }
  0xf2   :  { %v199_v8 = vrot.slane %v195_v7, 6  ;;  %v345_v49 = vsel %vm2207_vm1, %v337_v44, %v341_v45 }
  0xf3   :  { %v273_v9 = vadd.f32 %v272_v52, %v198_v6  ;;  %v346_v50 = vsel %vm2211_vm2, %v338_v47, %v342_v48  ;;  %v349_v51 = vrot.slane %v345_v49, 4 }
  0xf4   :  { %v275_v10 = vadd.f32 %v274_v55, %v199_v8  ;;  %v350_v53 = vrot.slane %v346_v50, 4 }
  0xf5   :  { %v1604_v14 = vmul.f32 -1.442695, %v273_v9 }
  0xf6   :  { %1856 = vtanh.f32 %v275_v10  ;;  %v1605_v29 = vmul.f32 -1.442695, %v275_v10 }
  0xf7   :  { %1858 = vpow2.f32 %v1604_v14 }
 0x100   :  { %v1857_v13 = vpop.eup %1856 }
 0x101   :  { %292 = vrot.lane.b32.xlu0 %v1857_v13, %s2028_s3  ;;  %v1859_v15 = vpop.eup %1858 }
 0x102   :  { %v283_v17 = vadd.f32 1.0, %v1859_v15  ;;  %v475_v15 = vld [vmem:[#allocation2] sm:$0x4] }
 0x104   :  { %1860 = vrcp.f32 %v283_v17  ;;  %v479_v17 = vld [vmem:[#allocation2] sm:$0x20] }
 0x10e   :  { %v1861_v18 = vpop.eup %1860 }
 0x10f   :  { %v290_v23 = vmul.f32 0.0, %v1861_v18 }
 0x173   :  { %v293_v19 = vpop.permute.xlu0 %292 }
 0x174   :  { %v295_v22 = vmul.f32 %v1861_v18, %v293_v19  ;;  %v476_v18 = vld [vmem:[#allocation2 + $0x8] sm:$0x4]  ;;  %v480_v19 = vld [vmem:[#allocation2 + $0x8] sm:$0x20] }
 0x176   :  { %297 = vrot.lane.b32.xlu0 %v295_v22, %s2028_s3  ;;  %v477_v22 = vunpack.c.l.bf16 %v475_v15 }
 0x1e8   :  { %v298_v24 = vpop.permute.xlu0 %297 }
 0x1e9   :  { %v300_v25 = vadd.f32 %v298_v24, %v290_v23  ;;  %v483_v23 = vrot.slane %v479_v17, 4  ;;  %v478_v24 = vunpack.c.l.bf16 %v476_v18 }
 0x1eb   :  { %1862 = vtanh.f32 %v300_v25 }
 0x1ec   :  { %1864 = vpow2.f32 %v1605_v29  ;;  %v491_v29 = vrot.slane %v477_v22, 2 }
 0x1f5   :  { %v1863_v28 = vpop.eup %1862 }
 0x1f6   :  { %303 = vrot.lane.b32.xlu1 %v1863_v28, %s2028_s3  ;;  %v1865_v31 = vpop.eup %1864  ;;  %v487_v28 = vunpack.c.l.bf16 %v483_v23 }
 0x1f7   :  { %v284_v32 = vadd.f32 1.0, %v1865_v31 }
 0x1f9   :  { %1866 = vrcp.f32 %v284_v32  ;;  %v492_v32 = vrot.slane %v478_v24, 2 }
 0x203   :  { %v1867_v33 = vpop.eup %1866 }
 0x268   :  { %v304_v34 = vpop.permute.xlu1 %303 }
 0x269   :  { %v306_v35 = vmul.f32 %v1867_v33, %v304_v34  ;;  %v495_v33 = vsel %vm2207_vm1, %v487_v28, %v491_v29 }
 0x26b   :  { %308 = vst.msk [vmem:[#allocation3] sm:$0x3] %vm307_vm3, %v306_v35  ;;  %1606 = vmatmul.mubr.msk.f32.vlgmr.msra.gmra.mrb[4].mxu0 %vm202_vm4, %v306_v35  ;;  %v499_v35 = vrot.slane %v495_v33, 2 }
 0x26c   :  { %1738 = vmatpush1.bf16.msra.mxu0 %v2121_v12  ;;  %714 = vmatprep.mubr.f32.mxu0 %v2027_v4 }
 0x26d   :  { %1740 = vmatprep.subr.bf16.mxu0 %v2132_v16 }
 0x270   :  { %1742 = vmatpush1.bf16.msra.mxu0 %v2145_v20 }
 0x271   :  { %1744 = vmatprep.subr.bf16.mxu0 %v2149_v21 }
 0x274   :  { %1746 = vmatpush1.bf16.msra.mxu0 %v2166_v26 }
 0x275   :  { %1748 = vmatprep.subr.bf16.mxu0 %v2170_v27 }
 0x278   :  { %1750 = vmatpush1.bf16.msra.mxu0 %v2180_v30 }
 0x279   :  { %1768 = vmatprep.subr.bf16.mxu0 %v2119_v11 }
 0x33e   :  { %v422_v52 = vpop.f32.mrb[4].mxu0 }
 0x33f   :  { %v423_v54 = vadd.f32 %v422_v52, %v349_v51  ;;  %v424_v55 = vpop.f32.mrb[5].mxu0 }
 0x340   :  { %v425_v56 = vadd.f32 %v424_v55, %v350_v53 }
 0x341   :  { %v1607_v58 = vmul.f32 -1.442695, %v423_v54 }
 0x342   :  { %1868 = vtanh.f32 %v425_v56  ;;  %v1608_v7 = vmul.f32 -1.442695, %v425_v56 }
 0x343   :  { %1870 = vpow2.f32 %v1607_v58  ;;  %v625_v58 = vld [vmem:[#allocation2] sm:$0x8] }
 0x34c   :  { %v1869_v57 = vpop.eup %1868 }
 0x34d   :  { %442 = vrot.lane.b32.xlu1 %v1869_v57, %s2028_s3  ;;  %v1871_v59 = vpop.eup %1870 }
 0x34e   :  { %v433_v61 = vadd.f32 1.0, %v1871_v59  ;;  %v629_v59 = vld [vmem:[#allocation2] sm:$0x10] }
 0x350   :  { %1872 = vrcp.f32 %v433_v61  ;;  %v626_v61 = vld [vmem:[#allocation2 + $0x8] sm:$0x8] }
 0x35a   :  { %v1873_v62 = vpop.eup %1872 }
 0x35b   :  { %v440_v2 = vmul.f32 %v1873_v62, %v300_v25  ;;  %v484_v25 = vrot.slane %v480_v19, 4 }
 0x35d   :  { %v488_v31 = vunpack.c.l.bf16 %v484_v25 }
 0x35f   :  { %v496_v34 = vsel %vm2211_vm2, %v488_v31, %v492_v32 }
 0x360   :  { %v500_v36 = vrot.slane %v496_v34, 2 }
 0x3bf   :  { %v443_v0 = vpop.permute.xlu1 %442 }
 0x3c0   :  { %v445_v1 = vmul.f32 %v1873_v62, %v443_v0  ;;  %v630_v62 = vld [vmem:[#allocation2 + $0x8] sm:$0x10]  ;;  %v627_v0 = vunpack.c.l.bf16 %v625_v58 }
 0x3c2   :  { %447 = vrot.lane.b32.xlu0 %v445_v1, %s2028_s3  ;;  %v633_v1 = vrot.slane %v629_v59, 4 }
 0x434   :  { %v448_v3 = vpop.permute.xlu0 %447 }
 0x435   :  { %v450_v5 = vadd.f32 %v448_v3, %v440_v2  ;;  %v628_v2 = vunpack.c.l.bf16 %v626_v61  ;;  %v634_v3 = vrot.slane %v630_v62, 4 }
 0x437   :  { %1874 = vtanh.f32 %v450_v5 }
 0x438   :  { %1876 = vpow2.f32 %v1608_v7  ;;  %v638_v7 = vunpack.c.l.bf16 %v634_v3 }
 0x441   :  { %v1875_v6 = vpop.eup %1874 }
 0x442   :  { %453 = vrot.lane.b32.xlu1 %v1875_v6, %s2028_s3  ;;  %v1877_v8 = vpop.eup %1876  ;;  %v641_v6 = vrot.slane %v627_v0, 6 }
 0x443   :  { %v434_v9 = vadd.f32 1.0, %v1877_v8  ;;  %v642_v8 = vrot.slane %v628_v2, 6 }
 0x445   :  { %1878 = vrcp.f32 %v434_v9 }
 0x44f   :  { %v1879_v10 = vpop.eup %1878 }
 0x4b4   :  { %v454_v13 = vpop.permute.xlu1 %453 }
 0x4b5   :  { %v456_v14 = vmul.f32 %v1879_v10, %v454_v13 }
 0x4b7   :  { %458 = vst.msk [vmem:[#allocation3 + $0x2] sm:$0x3] %vm307_vm3, %v456_v14  ;;  %1609 = vmatmul.mubr.msk.f32.vlgmr.msra.gmra.mrb[2].mxu1 %vm202_vm4, %v456_v14  ;;  %v646_v14 = vsel %vm2211_vm2, %v638_v7, %v642_v8 }
 0x4b8   :  { %1754 = vmatpush1.bf16.msra.mxu1 %v2121_v12  ;;  %864 = vmatprep.mubr.f32.mxu1 %v2027_v4 }
 0x4b9   :  { %1756 = vmatprep.subr.bf16.mxu1 %v2132_v16 }
 0x4bc   :  { %1758 = vmatpush1.bf16.msra.mxu1 %v2145_v20 }
 0x4bd   :  { %1760 = vmatprep.subr.bf16.mxu1 %v2149_v21 }
 0x4c0   :  { %1762 = vmatpush1.bf16.msra.mxu1 %v2166_v26 }
 0x4c1   :  { %1764 = vmatprep.subr.bf16.mxu1 %v2170_v27 }
 0x4c4   :  { %1766 = vmatpush1.bf16.msra.mxu1 %v2180_v30 }
 0x4c5   :  { %1784 = vmatprep.subr.bf16.mxu1 %v2119_v11 }
 0x58a   :  { %v572_v11 = vpop.f32.mrb[2].mxu1 }
 0x58b   :  { %v573_v37 = vadd.f32 %v572_v11, %v499_v35  ;;  %v574_v38 = vpop.f32.mrb[3].mxu1 }
 0x58c   :  { %v575_v39 = vadd.f32 %v574_v38, %v500_v36 }
 0x58d   :  { %v1610_v41 = vmul.f32 -1.442695, %v573_v37 }
 0x58e   :  { %1880 = vtanh.f32 %v575_v39  ;;  %v1611_v52 = vmul.f32 -1.442695, %v575_v39  ;;  %v769_v39 = vld [vmem:[#allocation2] sm:$0x10] }
 0x58f   :  { %1882 = vpow2.f32 %v1610_v41  ;;  %v773_v41 = vrot.slane %v769_v39, 4 }
 0x598   :  { %v1881_v40 = vpop.eup %1880 }
 0x599   :  { %592 = vrot.lane.b32.xlu0 %v1881_v40, %s2028_s3  ;;  %v1883_v42 = vpop.eup %1882  ;;  %v770_v40 = vld [vmem:[#allocation2 + $0x8] sm:$0x10] }
 0x59a   :  { %v583_v43 = vadd.f32 1.0, %v1883_v42  ;;  %v774_v42 = vrot.slane %v770_v40, 4 }
 0x59c   :  { %1884 = vrcp.f32 %v583_v43  ;;  %v777_v43 = vunpack.c.l.bf16 %v773_v41 }
 0x5a6   :  { %v1885_v44 = vpop.eup %1884 }
 0x5a7   :  { %v590_v48 = vmul.f32 %v1885_v44, %v450_v5  ;;  %v637_v5 = vunpack.c.l.bf16 %v633_v1 }
 0x5a9   :  { %v645_v9 = vsel %vm2207_vm1, %v637_v5, %v641_v6 }
 0x60b   :  { %v593_v45 = vpop.permute.xlu0 %592 }
 0x60c   :  { %v595_v47 = vmul.f32 %v1885_v44, %v593_v45  ;;  %v779_v44 = vld [vmem:[#allocation2] sm:$0x8]  ;;  %v785_v45 = vrot.slane %v777_v43, 2 }
 0x60e   :  { %597 = vrot.lane.b32.xlu1 %v595_v47, %s2028_s3  ;;  %v780_v47 = vld [vmem:[#allocation2 + $0x8] sm:$0x8] }
 0x680   :  { %v598_v49 = vpop.permute.xlu1 %597 }
 0x681   :  { %v600_v50 = vadd.f32 %v598_v49, %v590_v48  ;;  %v781_v48 = vunpack.c.l.bf16 %v779_v44 }
 0x683   :  { %1886 = vtanh.f32 %v600_v50 }
 0x684   :  { %1888 = vpow2.f32 %v1611_v52 }
 0x68d   :  { %v1887_v51 = vpop.eup %1886 }
 0x68e   :  { %603 = vrot.lane.b32.xlu0 %v1887_v51, %s2028_s3  ;;  %v1889_v53 = vpop.eup %1888 }
 0x68f   :  { %v584_v54 = vadd.f32 1.0, %v1889_v53 }
 0x691   :  { %1890 = vrcp.f32 %v584_v54 }
 0x69b   :  { %v1891_v55 = vpop.eup %1890 }
 0x700   :  { %v604_v56 = vpop.permute.xlu0 %603 }
 0x701   :  { %v606_v57 = vmul.f32 %v1891_v55, %v604_v56 }
 0x703   :  { %608 = vst.msk [vmem:[#allocation3 + $0x4] sm:$0x3] %vm307_vm3, %v606_v57  ;;  %1612 = vmatmul.mubr.msk.f32.vlgmr.msra.gmra.mrb[6].mxu0 %vm202_vm4, %v606_v57 }
 0x704   :  { %1770 = vmatpush1.bf16.msra.mxu0 %v2121_v12  ;;  %1014 = vmatprep.mubr.f32.mxu0 %v2027_v4 }
 0x705   :  { %1772 = vmatprep.subr.bf16.mxu0 %v2132_v16 }
 0x708   :  { %1774 = vmatpush1.bf16.msra.mxu0 %v2145_v20 }
 0x709   :  { %1776 = vmatprep.subr.bf16.mxu0 %v2149_v21 }
 0x70c   :  { %1778 = vmatpush1.bf16.msra.mxu0 %v2166_v26 }
 0x70d   :  { %1780 = vmatprep.subr.bf16.mxu0 %v2170_v27 }
 0x710   :  { %1782 = vmatpush1.bf16.msra.mxu0 %v2180_v30 }
 0x7d6   :  { %v716_v10 = vpop.f32.mrb[6].mxu0 }
 0x7d7   :  { %v717_v13 = vadd.f32 %v716_v10, %v645_v9  ;;  %v718_v15 = vpop.f32.mrb[7].mxu0 }
 0x7d8   :  { %v719_v17 = vadd.f32 %v718_v15, %v646_v14  ;;  %v919_v15 = vld [vmem:[#allocation2] sm:$0x20] }
 0x7d9   :  { %v1613_v19 = vmul.f32 -1.442695, %v717_v13 }
 0x7da   :  { %1892 = vtanh.f32 %v719_v17  ;;  %v1614_v34 = vmul.f32 -1.442695, %v719_v17  ;;  %v920_v17 = vld [vmem:[#allocation2 + $0x8] sm:$0x20] }
 0x7db   :  { %1894 = vpow2.f32 %v1613_v19  ;;  %v924_v19 = vrot.slane %v920_v17, 4 }
 0x7e4   :  { %v1893_v18 = vpop.eup %1892 }
 0x7e5   :  { %736 = vrot.lane.b32.xlu1 %v1893_v18, %s2028_s3  ;;  %v1895_v22 = vpop.eup %1894  ;;  %v923_v18 = vrot.slane %v919_v15, 4 }
 0x7e6   :  { %v727_v23 = vadd.f32 1.0, %v1895_v22 }
 0x7e7   :  { %v927_v22 = vunpack.c.l.bf16 %v923_v18 }
 0x7e8   :  { %1896 = vrcp.f32 %v727_v23  ;;  %v928_v23 = vunpack.c.l.bf16 %v924_v19 }
 0x7f2   :  { %v1897_v24 = vpop.eup %1896 }
 0x7f3   :  { %v734_v29 = vmul.f32 %v1897_v24, %v600_v50 }
 0x857   :  { %v737_v25 = vpop.permute.xlu1 %736 }
 0x858   :  { %v739_v28 = vmul.f32 %v1897_v24, %v737_v25  ;;  %v929_v24 = vld [vmem:[#allocation2] sm:$0x4]  ;;  %v935_v25 = vrot.slane %v927_v22, 6 }
 0x85a   :  { %741 = vrot.lane.b32.xlu0 %v739_v28, %s2028_s3  ;;  %v930_v28 = vld [vmem:[#allocation2 + $0x8] sm:$0x4] }
 0x8cc   :  { %v742_v31 = vpop.permute.xlu0 %741 }
 0x8cd   :  { %v744_v32 = vadd.f32 %v742_v31, %v734_v29  ;;  %v936_v29 = vrot.slane %v928_v23, 6  ;;  %v931_v31 = vunpack.c.l.bf16 %v929_v24 }
 0x8cf   :  { %1898 = vtanh.f32 %v744_v32 }
 0x8d0   :  { %1900 = vpow2.f32 %v1614_v34 }
 0x8d9   :  { %v1899_v33 = vpop.eup %1898 }
 0x8da   :  { %747 = vrot.lane.b32.xlu1 %v1899_v33, %s2028_s3  ;;  %v1901_v35 = vpop.eup %1900  ;;  %v939_v33 = vsel %vm2207_vm1, %v931_v31, %v935_v25  ;;  %v1203_v31 = vld [vmem:[%s2503_s2] sm:$0xff] }
 0x8db   :  { %v728_v11 = vadd.f32 1.0, %v1901_v35  ;;  %v943_v35 = vrot.slane %v939_v33, 4  ;;  %v1205_v33 = vld [vmem:[%s2503_s2 + $0x10] sm:$0xff] }
 0x8dd   :  { %1902 = vrcp.f32 %v728_v11 }
 0x8e7   :  { %v1903_v36 = vpop.eup %1902 }
 0x94c   :  { %v748_v37 = vpop.permute.xlu1 %747 }
 0x94d   :  { %v750_v38 = vmul.f32 %v1903_v36, %v748_v37 }
 0x94f   :  { %752 = vst.msk [vmem:[#allocation3 + $0x6] sm:$0x3] %vm307_vm3, %v750_v38  ;;  %1615 = vmatmul.mubr.msk.f32.vlgmr.msra.gmra.mrb[4].mxu1 %vm202_vm4, %v750_v38 }
 0x950   :  { %1786 = vmatpush1.bf16.msra.mxu1 %v2121_v12  ;;  %1164 = vmatprep.mubr.f32.mxu1 %v2027_v4  ;;  %v778_v12 = vunpack.c.l.bf16 %v774_v42 }
 0x951   :  { %1788 = vmatprep.subr.bf16.mxu1 %v2132_v16 }
 0x952   :  { %v786_v16 = vrot.slane %v778_v12, 2 }
 0x954   :  { %1790 = vmatpush1.bf16.msra.mxu1 %v2145_v20  ;;  %v782_v20 = vunpack.c.l.bf16 %v780_v47 }
 0x955   :  { %1792 = vmatprep.subr.bf16.mxu1 %v2149_v21  ;;  %v789_v21 = vsel %vm2207_vm1, %v781_v48, %v785_v45 }
 0x956   :  { %v1366_v9 = vld [vmem:[#allocation3 + $0x6] sm:$0x3] }
 0x958   :  { %1794 = vmatpush1.bf16.msra.mxu1 %v2166_v26  ;;  %v790_v26 = vsel %vm2211_vm2, %v782_v20, %v786_v16 }
 0x959   :  { %1796 = vmatprep.subr.bf16.mxu1 %v2170_v27  ;;  %v793_v27 = vrot.slane %v789_v21, 6  ;;  %v794_v49 = vrot.slane %v790_v26, 6 }
 0x95c   :  { %1798 = vmatpush1.bf16.msra.mxu1 %v2180_v30 }
 0xa22   :  { %v866_v30 = vpop.f32.mrb[4].mxu1 }
 0xa23   :  { %v867_v50 = vadd.f32 %v866_v30, %v793_v27  ;;  %v868_v51 = vpop.f32.mrb[5].mxu1 }
 0xa24   :  { %v869_v52 = vadd.f32 %v868_v51, %v794_v49  ;;  %v1360_v51 = vld [vmem:[#allocation3 + $0x4] sm:$0x3] }
 0xa25   :  { %v1616_v54 = vmul.f32 -1.442695, %v867_v50 }
 0xa26   :  { %1904 = vtanh.f32 %v869_v52  ;;  %v1617_v2 = vmul.f32 -1.442695, %v869_v52 }
 0xa27   :  { %1906 = vpow2.f32 %v1616_v54 }
 0xa30   :  { %v1905_v53 = vpop.eup %1904 }
 0xa31   :  { %886 = vrot.lane.b32.xlu0 %v1905_v53, %s2028_s3  ;;  %v1907_v55 = vpop.eup %1906 }
 0xa32   :  { %v877_v56 = vadd.f32 1.0, %v1907_v55  ;;  %v1069_v55 = vld [vmem:[#allocation2] sm:$0x40] }
 0xa34   :  { %1908 = vrcp.f32 %v877_v56  ;;  %v1070_v56 = vld [vmem:[#allocation2 + $0x8] sm:$0x40] }
 0xa3e   :  { %v1909_v57 = vpop.eup %1908 }
 0xa3f   :  { %v884_v61 = vmul.f32 %v1909_v57, %v744_v32  ;;  %v932_v32 = vunpack.c.l.bf16 %v930_v28  ;;  %v1204_v28 = vld [vmem:[%s2503_s2 + $0x8] sm:$0xff] }
 0xa41   :  { %v940_v34 = vsel %vm2211_vm2, %v932_v32, %v936_v29  ;;  %v1206_v29 = vld [vmem:[%s2503_s2 + $0x18] sm:$0xff] }
 0xa42   :  { %v944_v36 = vrot.slane %v940_v34, 4  ;;  %v1799_v32 = vpack.c.bf16 %v1206_v29, %v1204_v28  ;;  %v1208_v34 = vld [vmem:[%s2503_s2 + $0x28] sm:$0xff] }
 0xa44   :  { %1800 = vmatprep.subr.bf16.mxu0 %v1799_v32  ;;  %v1465_v32 = vld [vmem:[%s2507_s6 + $0x10] sm:$0xff] }
 0xaa3   :  { %v887_v58 = vpop.permute.xlu0 %886 }
 0xaa4   :  { %v889_v59 = vmul.f32 %v1909_v57, %v887_v58  ;;  %v1073_v57 = vrot.slane %v1069_v55, 4  ;;  %v1074_v58 = vrot.slane %v1070_v56, 4 }
 0xaa6   :  { %891 = vrot.lane.b32.xlu1 %v889_v59, %s2028_s3  ;;  %v1077_v59 = vunpack.c.l.bf16 %v1073_v57 }
 0xb18   :  { %v892_v62 = vpop.permute.xlu1 %891 }
 0xb19   :  { %v894_v0 = vadd.f32 %v892_v62, %v884_v61  ;;  %v1078_v61 = vunpack.c.l.bf16 %v1074_v58  ;;  %v1079_v62 = vld [vmem:[#allocation2] sm:$0x2] }
 0xb1b   :  { %1910 = vtanh.f32 %v894_v0 }
 0xb1c   :  { %1912 = vpow2.f32 %v1617_v2  ;;  %v1086_v2 = vrot.slane %v1078_v61, 2  ;;  %v1219_v61 = vld [vmem:[#allocation2] sm:$0x80] }
 0xb25   :  { %v1911_v1 = vpop.eup %1910 }
 0xb26   :  { %897 = vrot.lane.b32.xlu0 %v1911_v1, %s2028_s3  ;;  %v1913_v3 = vpop.eup %1912  ;;  %v1080_v1 = vld [vmem:[#allocation2 + $0x8] sm:$0x2] }
 0xb27   :  { %v878_v5 = vadd.f32 1.0, %v1913_v3  ;;  %v1081_v3 = vunpack.c.l.bf16 %v1079_v62  ;;  %v1220_v62 = vld [vmem:[#allocation2 + $0x8] sm:$0x80] }
 0xb29   :  { %1914 = vrcp.f32 %v878_v5  ;;  %v1082_v5 = vunpack.c.l.bf16 %v1080_v1  ;;  %v1224_v1 = vrot.slane %v1220_v62, 4 }
 0xb33   :  { %v1915_v6 = vpop.eup %1914 }
 0xb98   :  { %v898_v7 = vpop.permute.xlu0 %897 }
 0xb99   :  { %v900_v8 = vmul.f32 %v1915_v6, %v898_v7  ;;  %v1090_v7 = vsel %vm2211_vm2, %v1082_v5, %v1086_v2  ;;  %v1229_v5 = vld [vmem:[#allocation2] sm:$0x1] }
 0xb9b   :  { %902 = vst.msk [vmem:[#allocation3 + $0x8] sm:$0x3] %vm307_vm3, %v900_v8  ;;  %1618 = vmatmul.mubr.msk.f32.vlgmr.msra.gmra.mrb[8].mxu0 %vm202_vm4, %v900_v8 }
 0xb9c   :  { %1308 = vmatprep.mubr.f32.mxu0 %v2027_v4 }
 0xba2   :  { %v1367_v10 = vld [vmem:[#allocation3 + $0x8] sm:$0x3] }
 0xba3   :  { %v1368_v13 = vsel %vm1347_vm5, %v1366_v9, %v1367_v10  ;;  %v1370_v14 = vsel %vm1347_vm5, %v1367_v10, %v1366_v9  ;;  %v1094_v10 = vrot.slane %v1090_v7, 2  ;;  %v1230_v7 = vld [vmem:[#allocation2 + $0x8] sm:$0x1] }
 0xba4   :  { %1369 = vst.msk [vmem:[#allocation3 + $0x6] sm:$0x3] %vm307_vm3, %v1368_v13  ;;  %1371 = vst.msk [vmem:[#allocation3 + $0x8] sm:$0x3] %vm307_vm3, %v1370_v14 }
 0xc6e   :  { %v1016_v11 = vpop.f32.mrb[8].mxu0 }
 0xc6f   :  { %v1017_v37 = vadd.f32 %v1016_v11, %v943_v35  ;;  %v1018_v38 = vpop.f32.mrb[9].mxu0  ;;  %v1210_v35 = vld [vmem:[%s2503_s2 + $0x38] sm:$0xff]  ;;  %v1801_v11 = vpack.c.bf16 %v1205_v33, %v1203_v31  ;;  %v1464_v31 = vld [vmem:[%s2507_s6 + $0x8] sm:$0xff]  ;;  %v2029_v33 = vmov 0.0|0.0  }
 0xc70   :  { %v1019_v39 = vadd.f32 %v1018_v38, %v944_v36  ;;  %v1803_v36 = vpack.c.bf16 %v1210_v35, %v1208_v34  ;;  %v1209_v38 = vld [vmem:[%s2503_s2 + $0x30] sm:$0xff]  ;;  %v1828_v34 = vpack.c.bf16 %v1464_v31, %v1463_v63  ;;  %v1466_v35 = vld [vmem:[%s2507_s6 + $0x18] sm:$0xff]  ;;  %1815 = vmatprep.subr.bf16.mxu1 %v2029_v33 }
 0xc71   :  { %v1619_v41 = vmul.f32 -1.442695, %v1017_v37  ;;  %v1207_v37 = vld [vmem:[%s2503_s2 + $0x20] sm:$0xff]  ;;  %1802 = vmatpush1.bf16.msra.mxu0 %v1801_v11 }
 0xc72   :  { %1916 = vtanh.f32 %v1019_v39  ;;  %v1620_v21 = vmul.f32 -1.442695, %v1019_v39  ;;  %v1212_v39 = vld [vmem:[%s2503_s2 + $0x48] sm:$0xff]  ;;  %1804 = vmatprep.subr.bf16.mxu0 %v1803_v36  ;;  %v1372_v11 = vld [vmem:[%s2505_s4] sm:$0xff]  ;;  %v1831_v36 = vpack.c.bf16 %v1466_v35, %v1465_v32 }
 0xc73   :  { %1918 = vpow2.f32 %v1619_v41  ;;  %v1805_v41 = vpack.c.bf16 %v1209_v38, %v1207_v37  ;;  %v1373_v37 = vld [vmem:[%s2505_s4 + $0x8] sm:$0xff]  ;;  %v1467_v38 = vld [vmem:[%s2507_s6 + $0x20] sm:$0xff] }
 0xc75   :  { %1806 = vmatpush1.bf16.msra.mxu0 %v1805_v41 }
 0xc7c   :  { %v1917_v40 = vpop.eup %1916 }
 0xc7d   :  { %1036 = vrot.lane.b32.xlu1 %v1917_v40, %s2028_s3  ;;  %v1919_v42 = vpop.eup %1918  ;;  %v1214_v40 = vld [vmem:[%s2503_s2 + $0x58] sm:$0xff] }
 0xc7e   :  { %v1027_v43 = vadd.f32 1.0, %v1919_v42  ;;  %v1807_v42 = vpack.c.bf16 %v1214_v40, %v1212_v39  ;;  %v1468_v39 = vld [vmem:[%s2507_s6 + $0x28] sm:$0xff]  ;;  %v1816_v40 = vpack.c.bf16 %v1373_v37, %v1372_v11 }
 0xc7f   :  { %v1834_v41 = vpack.c.bf16 %v1468_v39, %v1467_v38 }
 0xc80   :  { %1920 = vrcp.f32 %v1027_v43  ;;  %v1211_v43 = vld [vmem:[%s2503_s2 + $0x40] sm:$0xff]  ;;  %1808 = vmatprep.subr.bf16.mxu0 %v1807_v42  ;;  %v1470_v42 = vld [vmem:[%s2507_s6 + $0x38] sm:$0xff] }
 0xc8a   :  { %v1921_v12 = vpop.eup %1920 }
 0xc8b   :  { %v1034_v47 = vmul.f32 %v1921_v12, %v894_v0  ;;  %v1085_v0 = vrot.slane %v1077_v59, 2 }
 0xc8d   :  { %v1089_v6 = vsel %vm2207_vm1, %v1081_v3, %v1085_v0  ;;  %v1223_v0 = vrot.slane %v1219_v61, 4  ;;  %v1228_v3 = vunpack.c.l.bf16 %v1224_v1 }
 0xc8e   :  { %v1093_v8 = vrot.slane %v1089_v6, 2 }
 0xc8f   :  { %v1227_v2 = vunpack.c.l.bf16 %v1223_v0 }
 0xc91   :  { %v1235_v6 = vrot.slane %v1227_v2, 6 }
 0xcef   :  { %v1037_v44 = vpop.permute.xlu1 %1036 }
 0xcf0   :  { %v1039_v45 = vmul.f32 %v1921_v12, %v1037_v44  ;;  %v1213_v12 = vld [vmem:[%s2503_s2 + $0x50] sm:$0xff]  ;;  %v1216_v44 = vld [vmem:[%s2503_s2 + $0x68] sm:$0xff] }
 0xcf2   :  { %1041 = vrot.lane.b32.xlu0 %v1039_v45, %s2028_s3  ;;  %v1218_v45 = vld [vmem:[%s2503_s2 + $0x78] sm:$0xff] }
 0xd64   :  { %v1042_v16 = vpop.permute.xlu0 %1041 }
 0xd65   :  { %v2308_v48 = vadd.f32 %v1042_v16, %v1034_v47  ;;  %v1809_v47 = vpack.c.bf16 %v1213_v12, %v1211_v43  ;;  %v1811_v16 = vpack.c.bf16 %v1218_v45, %v1216_v44  ;;  %v1374_v12 = vld [vmem:[%s2505_s4 + $0x10] sm:$0xff]  ;;  %v1375_v44 = vld [vmem:[%s2505_s4 + $0x18] sm:$0xff]  ;;  %v1376_v45 = vld [vmem:[%s2505_s4 + $0x20] sm:$0xff] }
 0xd67   :  { %1922 = vtanh.f32 %v2308_v48  ;;  %1810 = vmatpush1.bf16.msra.mxu0 %v1809_v47  ;;  %v1819_v47 = vpack.c.bf16 %v1375_v44, %v1374_v12 }
 0xd68   :  { %1924 = vpow2.f32 %v1620_v21  ;;  %v1217_v21 = vld [vmem:[%s2503_s2 + $0x70] sm:$0xff]  ;;  %1812 = vmatprep.subr.bf16.mxu0 %v1811_v16  ;;  %v1377_v16 = vld [vmem:[%s2505_s4 + $0x28] sm:$0xff] }
 0xd71   :  { %v1923_v20 = vpop.eup %1922 }
 0xd72   :  { %1047 = vrot.lane.b32.xlu1 %v1923_v20, %s2028_s3  ;;  %v1925_v26 = vpop.eup %1924  ;;  %v1215_v20 = vld [vmem:[%s2503_s2 + $0x60] sm:$0xff] }
 0xd73   :  { %v1028_v27 = vadd.f32 1.0, %v1925_v26  ;;  %v1813_v26 = vpack.c.bf16 %v1217_v21, %v1215_v20  ;;  %v1822_v20 = vpack.c.bf16 %v1377_v16, %v1376_v45  ;;  %v1378_v21 = vld [vmem:[%s2505_s4 + $0x30] sm:$0xff] }
 0xd75   :  { %1926 = vrcp.f32 %v1028_v27  ;;  %1814 = vmatpush1.bf16.msra.mxu0 %v1813_v26  ;;  %v1379_v26 = vld [vmem:[%s2505_s4 + $0x38] sm:$0xff]  ;;  %s2031_s4 = smov [#allocation3]  }
 0xd76   :  { %1827 = vmatprep.subr.bf16.mxu0 %v2029_v33 }
 0xd7f   :  { %v1927_v30 = vpop.eup %1926 }
 0xde4   :  { %v1048_v49 = vpop.permute.xlu1 %1047 }
 0xde5   :  { %v1050_v50 = vmul.f32 %v1927_v30, %v1048_v49 }
 0xde7   :  { %1052 = vst.msk [vmem:[#allocation3 + $0xa] sm:$0x3] %vm307_vm3, %v1050_v50  ;;  %1621 = vmatmul.mubr.msk.f32.vlgmr.msra.gmra.mrb[6].mxu1 %vm202_vm4, %v1050_v50 }
 0xde8   :  { %1665 = vmatprep.mubr.msk.f32.mxu1 %vm2030_vm6, %v2027_v4  ;;  %1817 = vmatpush3.bf16.msra.mxu1 %v1816_v40 }
 0xde9   :  { %1818 = vmatprep.subr.bf16.mxu1 %v2029_v33 }
 0xdec   :  { %1820 = vmatpush3.bf16.msra.mxu1 %v1819_v47 }
 0xded   :  { %1821 = vmatprep.subr.bf16.mxu1 %v2029_v33 }
 0xdee   :  { %v1361_v52 = vld [vmem:[#allocation3 + $0xa] sm:$0x3] }
 0xdef   :  { %v1362_v53 = vsel %vm1347_vm5, %v1360_v51, %v1361_v52  ;;  %v1364_v54 = vsel %vm1347_vm5, %v1361_v52, %v1360_v51 }
 0xdf0   :  { %1363 = vst.msk [vmem:[#allocation3 + $0x4] sm:$0x3] %vm307_vm3, %v1362_v53  ;;  %1365 = vst.msk [vmem:[#allocation3 + $0xa] sm:$0x3] %vm307_vm3, %v1364_v54  ;;  %1823 = vmatpush3.bf16.msra.mxu1 %v1822_v20 }
 0xdf1   :  { %1824 = vmatprep.subr.bf16.mxu1 %v2029_v33 }
 0xeba   :  { %v1166_v9 = vpop.f32.mrb[6].mxu1 }
 0xebb   :  { %v1167_v13 = vadd.f32 %v1166_v9, %v1093_v8  ;;  %v1168_v14 = vpop.f32.mrb[7].mxu1  ;;  %v1236_v8 = vrot.slane %v1228_v3, 6  ;;  %v1231_v9 = vunpack.c.l.bf16 %v1229_v5 }
 0xebc   :  { %v1169_v15 = vadd.f32 %v1168_v14, %v1094_v10  ;;  %v1232_v10 = vunpack.c.l.bf16 %v1230_v7 }
 0xebd   :  { %v1622_v18 = vmul.f32 -1.442695, %v1167_v13  ;;  %v1239_v13 = vsel %vm2207_vm1, %v1231_v9, %v1235_v6 }
 0xebe   :  { %1928 = vtanh.f32 %v1169_v15  ;;  %v1623_v51 = vmul.f32 -1.442695, %v1169_v15 }
 0xebf   :  { %1930 = vpow2.f32 %v1622_v18 }
 0xec8   :  { %v1929_v17 = vpop.eup %1928 }
 0xec9   :  { %1186 = vrot.lane.b32.xlu0 %v1929_v17, %s2028_s3  ;;  %v1931_v19 = vpop.eup %1930  ;;  %v1240_v17 = vsel %vm2211_vm2, %v1232_v10, %v1236_v8 }
 0xeca   :  { %v1177_v22 = vadd.f32 1.0, %v1931_v19 }
 0xecc   :  { %1932 = vrcp.f32 %v1177_v22 }
 0xed6   :  { %v1933_v23 = vpop.eup %1932 }
 0xed7   :  { %v1184_v27 = vmul.f32 %v1933_v23, %v2308_v48  ;;  %v1354_v48 = vld [vmem:[#allocation3 + $0x2] sm:$0x3] }
 0xf3b   :  { %v1187_v24 = vpop.permute.xlu0 %1186 }
 0xf3c   :  { %v1189_v25 = vmul.f32 %v1933_v23, %v1187_v24 }
 0xf3e   :  { %1191 = vrot.lane.b32.xlu1 %v1189_v25, %s2028_s3 }
 0xfb0   :  { %v1192_v30 = vpop.permute.xlu1 %1191 }
 0xfb1   :  { %v2375_v49 = vadd.f32 %v1192_v30, %v1184_v27  ;;  %v1825_v27 = vpack.c.bf16 %v1379_v26, %v1378_v21 }
 0xfb3   :  { %1934 = vtanh.f32 %v2375_v49  ;;  %1826 = vmatpush3.bf16.msra.mxu1 %v1825_v27 }
 0xfb4   :  { %1936 = vpow2.f32 %v1623_v51 }
 0xfbd   :  { %v1935_v50 = vpop.eup %1934 }
 0xfbe   :  { %1197 = vrot.lane.b32.xlu0 %v1935_v50, %s2028_s3  ;;  %v1937_v52 = vpop.eup %1936 }
 0xfbf   :  { %v1178_v53 = vadd.f32 1.0, %v1937_v52 }
 0xfc1   :  { %1938 = vrcp.f32 %v1178_v53 }
 0xfcb   :  { %v1939_v54 = vpop.eup %1938 }
0x1030   :  { %v1198_v55 = vpop.permute.xlu0 %1197 }
0x1031   :  { %v1200_v56 = vmul.f32 %v1939_v54, %v1198_v55 }
0x1033   :  { %1202 = vst.msk [vmem:[#allocation3 + $0xc] sm:$0x3] %vm307_vm3, %v1200_v56  ;;  %1624 = vmatmul.mubr.msk.f32.vlgmr.msra.gmra.mrb[10].mxu0 %vm202_vm4, %v1200_v56 }
0x1034   :  { %1684 = vmatprep.mubr.msk.f32.mxu0 %vm2030_vm6, %v2027_v4  ;;  %1829 = vmatpush3.bf16.msra.mxu0 %v1828_v34  ;;  %v1469_v4 = vld [vmem:[%s2507_s6 + $0x30] sm:$0xff] }
0x1035   :  { %1830 = vmatprep.subr.bf16.mxu0 %v2029_v33  ;;  %v1837_v43 = vpack.c.bf16 %v1470_v42, %v1469_v4 }
0x1038   :  { %1832 = vmatpush3.bf16.msra.mxu0 %v1831_v36 }
0x1039   :  { %1833 = vmatprep.subr.bf16.mxu0 %v2029_v33 }
0x103a   :  { %v1355_v57 = vld [vmem:[#allocation3 + $0xc] sm:$0x3] }
0x103b   :  { %v1356_v58 = vsel %vm1347_vm5, %v1354_v48, %v1355_v57  ;;  %v1358_v59 = vsel %vm1347_vm5, %v1355_v57, %v1354_v48 }
0x103c   :  { %1357 = vst.msk [vmem:[#allocation3 + $0x2] sm:$0x3] %vm307_vm3, %v1356_v58  ;;  %1359 = vst.msk [vmem:[#allocation3 + $0xc] sm:$0x3] %vm307_vm3, %v1358_v59  ;;  %1835 = vmatpush3.bf16.msra.mxu0 %v1834_v41  ;;  %v1348_v58 = vld [vmem:[#allocation3] sm:$0x3] }
0x103d   :  { %1836 = vmatprep.subr.bf16.mxu0 %v2029_v33 }
0x1040   :  { %1838 = vmatpush3.bf16.msra.mxu0 %v1837_v43 }
0x1106   :  { %v1310_v14 = vpop.f32.mrb[10].mxu0 }
0x1107   :  { %v1311_v15 = vadd.f32 %v1310_v14, %v1239_v13  ;;  %v1312_v18 = vpop.f32.mrb[11].mxu0 }
0x1108   :  { %v2391_v19 = vadd.f32 %v1312_v18, %v1240_v17 }
0x1109   :  { %v1625_v23 = vmul.f32 -1.442695, %v1311_v15 }
0x110a   :  { %1940 = vtanh.f32 %v2391_v19  ;;  %v1626_v53 = vmul.f32 -1.442695, %v2391_v19 }
0x110b   :  { %1942 = vpow2.f32 %v1625_v23 }
0x1114   :  { %v1941_v22 = vpop.eup %1940 }
0x1115   :  { %1330 = vrot.lane.b32.xlu1 %v1941_v22, %s2028_s3  ;;  %v1943_v24 = vpop.eup %1942 }
0x1116   :  { %v1321_v25 = vadd.f32 1.0, %v1943_v24 }
0x1118   :  { %1944 = vrcp.f32 %v1321_v25 }
0x1122   :  { %v1945_v60 = vpop.eup %1944 }
0x1123   :  { %v1328_v30 = vmul.f32 %v1945_v60, %v2375_v49 }
0x1187   :  { %v1331_v28 = vpop.permute.xlu1 %1330 }
0x1188   :  { %v1333_v29 = vmul.f32 %v1945_v60, %v1331_v28 }
0x118a   :  { %1335 = vrot.lane.b32.xlu0 %v1333_v29, %s2028_s3 }
0x11fc   :  { %v1336_v50 = vpop.permute.xlu0 %1335 }
0x11fd   :  { %v1338_v51 = vadd.f32 %v1336_v50, %v1328_v30 }
0x11ff   :  { %1946 = vtanh.f32 %v1338_v51  ;;  %1479 = vrot.lane.b32.xlu0 %v1338_v51, %s2028_s3 }
0x1200   :  { %1948 = vpow2.f32 %v1626_v53 }
0x1209   :  { %v1947_v52 = vpop.eup %1946 }
0x120a   :  { %1341 = vrot.lane.b32.xlu1 %v1947_v52, %s2028_s3  ;;  %v1949_v54 = vpop.eup %1948  ;;  %s1560_s3 = sshll.u32 %s2031_s4, 4  ;;  %s1561_s3 = int_to_ptr.vmem [resolvable:$true] %s1560_s3 }
0x120b   :  { %v1322_v55 = vadd.f32 1.0, %v1949_v54  ;;  %s1956_s30 = scalar_lea.vmem %s1561_s3, 256  ;;  %p1961_p1 = scmp.lt.s32.totalorder %s1561_s3, %s1561_s3 }
0x120c   :  { %p1957_p0 = scmp.ne.s32.totalorder %s1561_s3, %s1956_s30  ;;  %p1962_p2 = scmp.lt.s32.totalorder %s1956_s30, %s1956_s30 }
0x120d   :  { %1950 = vrcp.f32 %v1322_v55 }
0x120e   :  { %p1963_p3 = por %p1962_p2, %p1961_p1 }
0x1210   :  { %p1964_p4 = pnand %p1963_p3, %p1957_p0 }
0x1217   :  { %v1951_v48 = vpop.eup %1950 }
0x1271   :  { %v1480_v56 = vpop.permute.xlu0 %1479 }
0x1272   :  { %1685 = vmatmul.mubr.msk.f32.vlgmr.msra.gmra.mrb[12].mxu0 %vm202_vm4, %v1480_v56 }
0x127c   :  { %v1342_v49 = vpop.permute.xlu1 %1341 }
0x127d   :  { %v1344_v57 = vmul.f32 %v1951_v48, %v1342_v49 }
0x127f   :  { %1346 = vst.msk [vmem:[#allocation3 + $0xe] sm:$0x3] %vm307_vm3, %v1344_v57  ;;  %1666 = vmatmul.mubr.msk.f32.vlgmr.msra.gmra.mrb[8].mxu1 %vm202_vm4, %v1344_v57 }
0x1286   :  { %v1349_v59 = vld [vmem:[#allocation3 + $0xe] sm:$0x3] }
0x1287   :  { %v1350_v61 = vsel %vm1347_vm5, %v1348_v58, %v1349_v59  ;;  %v1352_v62 = vsel %vm1347_vm5, %v1349_v59, %v1348_v58 }
0x1288   :  { %1351 = vst.msk [vmem:[#allocation3] sm:$0x3] %vm307_vm3, %v1350_v61  ;;  %1353 = vst.msk [vmem:[#allocation3 + $0xe] sm:$0x3] %vm307_vm3, %v1352_v62 }
0x1289   :  { %1967 = shalt.err (!%p1964_p4)
}
0x128a   :  { %s1968_s0 = scalar_lea.hbm %s2509_s8, 256 }
0x128b   :  { %p1969_p5 = scmp.ne.s32.totalorder %s2509_s8, %s1968_s0  ;;  %p1972_p6 = scmp.lt.u32.totalorder %s1968_s0, %s2509_s8 }
0x128d   :  { %p1974_p7 = pnand %p1972_p6, %p1969_p5 }
0x128f   :  { %1977 = shalt.err (!%p1974_p7)
}
0x1290   :  { %s2032_s16 = smov 32   ;;  %s2033_s17 = smov 2   ;;  %v1629_v46 = vld [vmem:[%s2508_s7] ss:$0 sm:$0xff]  ;;  %vm1461_vm7 = vcmask 254976  }
0x1291   :  { %1566 = dma.vmem_to_hbm [thread:$0]  %s1561_s3, 256, %s2509_s8, [#allocation4], %s2032_s16, %s2032_s16, %s2033_s17  }
0x1292   :  { %v1627_v3 = vld [vmem:[%s2506_s5] ss:$0 sm:$0xff]  ;;  %s2034_s8 = smov [#allocation5]   ;;  %s2035_s24 = smov [#allocation7]  }
0x1293   :  { %s1573_s23 = sshll.u32 %s2034_s8, 4  ;;  %s1583_s25 = sshll.u32 %s2035_s24, 4  ;;  %s1574_s23 = int_to_ptr.vmem [resolvable:$true] %s1573_s23  ;;  %s1584_s25 = int_to_ptr.vmem [resolvable:$true] %s1583_s25 }
0x1294   :  { %s1978_s7 = scalar_lea.vmem %s1574_s23, 32  ;;  %p1983_p9 = scmp.lt.s32.totalorder %s1574_s23, %s1574_s23 }
0x1295   :  { %p1979_p8 = scmp.ne.s32.totalorder %s1574_s23, %s1978_s7  ;;  %p1984_p10 = scmp.lt.s32.totalorder %s1978_s7, %s1978_s7 }
0x1297   :  { %p1985_p11 = por %p1984_p10, %p1983_p9 }
0x1299   :  { %p1986_p12 = pnand %p1985_p11, %p1979_p8 }
0x1345   :  { %v1549_v0 = vpop.f32.mrb[12].mxu0 }
0x1346   :  { %v1550_v1 = vadd.f32 %v1629_v46, %v1549_v0  ;;  %v1686_v2 = vpop.f32.mrb[13].mxu0 }
0x1348   :  { %1952 = vtanh.f32 %v1550_v1 }
0x1352   :  { %v1953_v5 = vpop.eup %1952  ;;  %v1456_v6 = vpop.f32.mrb[8].mxu1 }
0x1353   :  { %v1457_v7 = vadd.f32 %v1627_v3, %v1456_v6  ;;  %v1667_v8 = vpop.f32.mrb[9].mxu1  ;;  %1554 = vst.msk [vmem:[#allocation7] sm:$0x3] %vm1461_vm7, %v1953_v5 }
0x1355   :  { %1954 = vtanh.f32 %v1457_v7 }
0x135f   :  { %v1955_v9 = vpop.eup %1954 }
0x1360   :  { %1462 = vst.msk [vmem:[#allocation5] sm:$0x3] %vm1461_vm7, %v1955_v9 }
0x1361   :  { %1989 = shalt.err (!%p1986_p12)
}
0x1362   :  { %s1990_s6 = scalar_lea.hbm %s2510_s9, 32 }
0x1363   :  { %p1991_p13 = scmp.ne.s32.totalorder %s2510_s9, %s1990_s6  ;;  %p1994_p0 = scmp.lt.u32.totalorder %s1990_s6, %s2510_s9 }
0x1365   :  { %p1996_p1 = pnand %p1994_p0, %p1991_p13 }
0x1367   :  { %1999 = shalt.err (!%p1996_p1)
}
0x1368   :  { %1576 = dma.vmem_to_hbm [thread:$0]  %s1574_s23, 32, %s2510_s9, [#allocation6]  }
0x1369   :  { %s2000_s1 = scalar_lea.vmem %s1584_s25, 32  ;;  %p2005_p3 = scmp.lt.s32.totalorder %s1584_s25, %s1584_s25 }
0x136a   :  { %p2001_p2 = scmp.ne.s32.totalorder %s1584_s25, %s2000_s1  ;;  %p2006_p4 = scmp.lt.s32.totalorder %s2000_s1, %s2000_s1 }
0x136c   :  { %p2007_p5 = por %p2006_p4, %p2005_p3 }
0x136e   :  { %p2008_p6 = pnand %p2007_p5, %p2001_p2 }
0x1370   :  { %2011 = shalt.err (!%p2008_p6)
}
0x1371   :  { %s2012_s12 = scalar_lea.hbm %s2511_s10, 32 }
0x1372   :  { %p2013_p7 = scmp.ne.s32.totalorder %s2511_s10, %s2012_s12  ;;  %p2016_p8 = scmp.lt.u32.totalorder %s2012_s12, %s2511_s10 }
0x1374   :  { %p2018_p9 = pnand %p2016_p8, %p2013_p7 }
0x1376   :  { %2021 = shalt.err (!%p2018_p9)
}
0x1377   :  { %1586 = dma.vmem_to_hbm [thread:$0]  %s1584_s25, 32, %s2511_s10, [#allocation6]  }
0x1378   :  { %2022 = dma.done.wait [#allocation4], 256  }
0x1379   :  { %2023 = vsyncadd [#allocation4], 4294967040 }
0x137a   :  { %2024 = dma.done.wait [#allocation6], 64  }
0x137b   :  { %2025 = vsyncadd [#allocation6], 4294967232 }
0x137c   :  { %1596 = vsyncpa [#allocation4], 1 }
0x137d   :  { %1597 = vsyncpa [#allocation6], 1 }

</bundles_post_ra>
